<compile_context>
chip_gen: v5e
topology: v5e:2x2
jax: 0.10.0
libtpu: 0.0.40
codegen_flags: <defaults>
</compile_context>

<pallas_src>
import math
import jax
import jax.numpy as jnp
from jax.experimental import pallas as pl
from jax.experimental.pallas import tpu as pltpu

# ---- small, BERT-shaped config (synthetic, not a checkpoint load) ----
B, S, H = 2, 8, 32          # batch, seq, hidden
NH, HD = 2, 16              # heads, head dim (NH*HD == H)
FF = 4 * H                  # intermediate size
VOCAB, MAX_POS = 100, 64
NLAYERS = 2
NCLASS = 2
LN_EPS = 1e-12              # BERT LayerNorm eps
ATT_SCALE = 1.0 / math.sqrt(HD)


# ---------------- shared math helpers (used both in-kernel and in the reference) --------
def _gelu(x):
    # TODO(synk): stock HF/PyTorch BERT uses exact erf-GELU; tanh approximation used consistently
    # in both the Pallas path and the reference below.
    c = math.sqrt(2.0 / math.pi)
    return 0.5 * x * (1.0 + jnp.tanh(c * (x + 0.044715 * x * x * x)))


def _layernorm(x, g, b):
    mu = jnp.mean(x, axis=-1, keepdims=True)
    var = jnp.mean((x - mu) ** 2, axis=-1, keepdims=True)
    return (x - mu) * jax.lax.rsqrt(var + LN_EPS) * g + b


# ---------------- the single fused kernel ----------------
def bert_fused_kernel(emb_ref, mask_ref, eg_ref, eb_ref,
                      wqkv_ref, bqkv_ref, wo_ref, bo_ref, g1_ref, be1_ref,
                      w1_ref, b1_ref, w2_ref, b2_ref, g2_ref, be2_ref,
                      wp_ref, bp_ref, wf_ref, bf_ref,
                      o_ref, x_vmem):
    layer = pl.program_id(0)

    # First grid step: embedding LayerNorm into the VMEM-resident activation.
    @pl.when(layer == 0)
    def _():
        x_vmem[...] = _layernorm(emb_ref[...], eg_ref[...], eb_ref[...])

    x = x_vmem[...]                                           # (B*S, H), f32, stays in VMEM

    # --- fused QKV projection: one MXU push of 3H output lanes ---
    qkv = jnp.dot(x, wqkv_ref[...], preferred_element_type=jnp.float32) + bqkv_ref[...]
    q = (qkv[:, 0:H] * ATT_SCALE).reshape(B, S, H)            # scale folded in once, not per head
    k = qkv[:, H:2 * H].reshape(B, S, H)
    v = qkv[:, 2 * H:3 * H].reshape(B, S, H)

    # Hoisted additive key mask broadcast (done once, not once per head).
    # NOTE: mask is applied to keys only (padded query rows never reach the pooler; only [CLS] does).
    bias = mask_ref[...][:, None, :]                          # (B, 1, S)

    # Per-head attention. NH==2, static unroll; the concat-of-heads is replaced by accumulating the
    # output projection per head (ctx_h @ Wo[rows of head h]), which removes the lane-shuffle concat.
    # (A fully batched (B*NH) dot_general would need a tiled<->untiled dim transpose that Mosaic
    #  does not reliably lower at these shapes, so the tiny static loop is kept.)
    attn = jnp.zeros((B * S, H), jnp.float32)
    for h in range(NH):
        qh = q[:, :, h * HD:(h + 1) * HD]
        kh = k[:, :, h * HD:(h + 1) * HD]
        vh = v[:, :, h * HD:(h + 1) * HD]
        s = jnp.einsum('bqd,bkd->bqk', qh, kh,
                       preferred_element_type=jnp.float32) + bias
        s = s - jnp.max(s, axis=-1, keepdims=True)
        p = jnp.exp(s)
        # softmax denominator via the EUP approximate reciprocal (frees VALU/divide slots).
        p = p * pl.reciprocal(jnp.sum(p, axis=-1, keepdims=True), approx=True)
        ctx = jnp.einsum('bqk,bkd->bqd', p, vh,
                         preferred_element_type=jnp.float32)  # (B, S, HD)
        attn = attn + jnp.dot(ctx.reshape(B * S, HD),
                              wo_ref[h * HD:(h + 1) * HD, :],
                              preferred_element_type=jnp.float32)
    attn = attn + bo_ref[...]

    # --- residual + LN, FFN, residual + LN ---
    h1 = _layernorm(x + attn, g1_ref[...], be1_ref[...])
    ff = _gelu(jnp.dot(h1, w1_ref[...], preferred_element_type=jnp.float32) + b1_ref[...])
    ff = jnp.dot(ff, w2_ref[...], preferred_element_type=jnp.float32) + b2_ref[...]
    x_new = _layernorm(h1 + ff, g2_ref[...], be2_ref[...])
    x_vmem[...] = x_new                                       # carry to next layer (stays in VMEM)

    # Last grid step: pooler (tanh on [CLS]) + classifier; the only HBM output of the whole kernel.
    @pl.when(layer == NLAYERS - 1)
    def _():
        cls = x_new.reshape(B, S, H)[:, 0, :]                 # (B, H) [CLS] rows
        pooled = jnp.tanh(
            jnp.dot(cls, wp_ref[...], preferred_element_type=jnp.float32) + bp_ref[...])
        o_ref[...] = jnp.dot(pooled, wf_ref[...],
                             preferred_element_type=jnp.float32) + bf_ref[...]


# ---------------- BlockSpec helpers ----------------
def _const_spec(shape):
    """Full-array block, same block every grid step (fetched once, stays in VMEM)."""
    nd = len(shape)
    return pl.BlockSpec(shape, lambda l, _nd=nd: (0,) * _nd)


def _layer_spec(shape):
    """Per-layer stacked weight: squeeze the leading NLAYERS dim and step it with the grid."""
    nd = len(shape)
    return pl.BlockSpec((None,) + tuple(shape[1:]),
                        lambda l, _nd=nd: (l,) + (0,) * (_nd - 1))


# ---------------- Pallas call wrapper (single call for the whole forward) ----------------
def bert_classifier_forward(params, input_ids, attention_mask):
    # Embedding table gathers are plain-JAX glue (word + position + token_type=0).
    emb = (params['word_emb'][input_ids]
           + params['pos_emb'][jnp.arange(S)][None, :, :]
           + params['type_emb'][0][None, None, :]).reshape(B * S, H)
    addmask = (1.0 - attention_mask.astype(jnp.float32)) * (-10000.0)   # (B, S) additive key mask

    args = (emb, addmask, params['emb_ln_g'], params['emb_ln_b'],
            params['wqkv'], params['bqkv'], params['wo'], params['bo'],
            params['ln1_g'], params['ln1_b'],
            params['w1'], params['b1'], params['w2'], params['b2'],
            params['ln2_g'], params['ln2_b'],
            params['pool_w'], params['pool_b'], params['fc_w'], params['fc_b'])

    in_specs = [
        _const_spec((B * S, H)),            # emb
        _const_spec((B, S)),                # additive attention mask
        _const_spec((1, H)),                # emb LN gamma
        _const_spec((1, H)),                # emb LN beta
        _layer_spec((NLAYERS, H, 3 * H)),   # fused Wqkv
        _layer_spec((NLAYERS, 1, 3 * H)),   # fused bqkv
        _layer_spec((NLAYERS, H, H)),       # Wo
        _layer_spec((NLAYERS, 1, H)),       # bo
        _layer_spec((NLAYERS, 1, H)),       # LN1 gamma
        _layer_spec((NLAYERS, 1, H)),       # LN1 beta
        _layer_spec((NLAYERS, H, FF)),      # W1
        _layer_spec((NLAYERS, 1, FF)),      # b1
        _layer_spec((NLAYERS, FF, H)),      # W2
        _layer_spec((NLAYERS, 1, H)),       # b2
        _layer_spec((NLAYERS, 1, H)),       # LN2 gamma
        _layer_spec((NLAYERS, 1, H)),       # LN2 beta
        _const_spec((H, H)),                # pooler W
        _const_spec((1, H)),                # pooler b
        _const_spec((H, NCLASS)),           # classifier W
        _const_spec((1, NCLASS)),           # classifier b
    ]

    return pl.pallas_call(
        bert_fused_kernel,
        out_shape=jax.ShapeDtypeStruct((B, NCLASS), jnp.float32),
        grid_spec=pltpu.PrefetchScalarGridSpec(
            num_scalar_prefetch=0,
            grid=(NLAYERS,),
            in_specs=in_specs,
            out_specs=_const_spec((B, NCLASS)),               # constant index -> resident output
            scratch_shapes=[pltpu.VMEM((B * S, H), jnp.float32)],   # activation carried across layers
        ),
        compiler_params=pltpu.CompilerParams(
            dimension_semantics=("arbitrary",)),              # layer axis is a sequential carry
    )(*args)


# ---------------- parameters (deterministic, synthetic; weights pre-stacked per layer) -----------
def init_params(key):
    keys = iter(jax.random.split(key, 64))

    def w(shape):
        return jax.random.normal(next(keys), shape, jnp.float32) * 0.02

    def zeros(shape):
        return jnp.zeros(shape, jnp.float32)

    def ones(shape):
        return jnp.ones(shape, jnp.float32)

    return {
        'word_emb': w((VOCAB, H)),
        'pos_emb': w((MAX_POS, H)),
        'type_emb': w((2, H)),
        'emb_ln_g': ones((1, H)), 'emb_ln_b': zeros((1, H)),
        'wqkv': w((NLAYERS, H, 3 * H)), 'bqkv': zeros((NLAYERS, 1, 3 * H)),
        'wo': w((NLAYERS, H, H)), 'bo': zeros((NLAYERS, 1, H)),
        'ln1_g': ones((NLAYERS, 1, H)), 'ln1_b': zeros((NLAYERS, 1, H)),
        'w1': w((NLAYERS, H, FF)), 'b1': zeros((NLAYERS, 1, FF)),
        'w2': w((NLAYERS, FF, H)), 'b2': zeros((NLAYERS, 1, H)),
        'ln2_g': ones((NLAYERS, 1, H)), 'ln2_b': zeros((NLAYERS, 1, H)),
        'pool_w': w((H, H)), 'pool_b': zeros((1, H)),
        'fc_w': w((H, NCLASS)), 'fc_b': zeros((1, NCLASS)),
    }


# ---------------- pure-JAX reference (same math, no Pallas) ----------------
def bert_classifier_reference(params, input_ids, attention_mask):
    with jax.default_matmul_precision("float32"):
        emb = (params['word_emb'][input_ids]
               + params['pos_emb'][jnp.arange(S)][None, :, :]
               + params['type_emb'][0][None, None, :])
        x = _layernorm(emb, params['emb_ln_g'], params['emb_ln_b'])
        addmask = (1.0 - attention_mask.astype(jnp.float32)) * (-10000.0)
        for l in range(NLAYERS):
            x2 = x.reshape(B * S, H)
            qkv = x2 @ params['wqkv'][l] + params['bqkv'][l]
            q = qkv[:, 0:H].reshape(B, S, H)
            k = qkv[:, H:2 * H].reshape(B, S, H)
            v = qkv[:, 2 * H:3 * H].reshape(B, S, H)
            parts = []
            for h in range(NH):
                qh, kh, vh = (t[:, :, h * HD:(h + 1) * HD] for t in (q, k, v))
                s = jnp.einsum('bqd,bkd->bqk', qh, kh) * ATT_SCALE + addmask[:, None, :]
                p = jax.nn.softmax(s, axis=-1)
                parts.append(jnp.einsum('bqk,bkd->bqd', p, vh))
            ctx = jnp.concatenate(parts, axis=-1)
            attn = (ctx.reshape(B * S, H) @ params['wo'][l] + params['bo'][l]).reshape(B, S, H)
            h1 = _layernorm(x + attn, params['ln1_g'][l], params['ln1_b'][l])
            ff = _gelu(h1.reshape(B * S, H) @ params['w1'][l] + params['b1'][l])
            ff = (ff @ params['w2'][l] + params['b2'][l]).reshape(B, S, H)
            x = _layernorm(h1 + ff, params['ln2_g'][l], params['ln2_b'][l])
        pooled = jnp.tanh(x[:, 0, :] @ params['pool_w'] + params['pool_b'])
        return pooled @ params['fc_w'] + params['fc_b']


if __name__ == "__main__":
    key = jax.random.PRNGKey(0)
    pkey, idkey = jax.random.split(key)
    params = init_params(pkey)

    input_ids = jax.random.randint(idkey, (B, S), 0, VOCAB, dtype=jnp.int32)
    # deterministic ragged attention mask: batch0 keeps all 8 tokens, batch1 keeps 6
    lengths = jnp.array([[S], [S - 2]], dtype=jnp.int32)
    attention_mask = (jnp.arange(S)[None, :] < lengths).astype(jnp.int32)

    logits = jax.jit(bert_classifier_forward)(params, input_ids, attention_mask)
    logits = jax.block_until_ready(logits)

    ref = bert_classifier_reference(params, input_ids, attention_mask)
    max_err = float(jnp.max(jnp.abs(logits - ref)))
    # Tolerance tightened 5x vs the previous version; remaining slack covers the EUP approximate
    # reciprocal used for the softmax denominator inside the kernel.
    if max_err > 2e-3:
        raise AssertionError(f"Pallas output mismatch vs reference: max_err={max_err}")

    # TODO(synk): real bert-base-uncased weights/tokenizer are not loadable here;
    # this uses a deterministically initialized, down-scaled BERT of identical structure.
    print("KERNEL_OK")
</pallas_src>

<mosaic_0001>
module attributes {stable_mosaic.version = 11 : i64} {
  func.func @bert_fused_kernel(%arg0: i32, %arg1: memref<16x32xf32, #tpu.memory_space<vmem>>, %arg2: memref<2x8xf32, #tpu.memory_space<vmem>>, %arg3: memref<1x32xf32, #tpu.memory_space<vmem>>, %arg4: memref<1x32xf32, #tpu.memory_space<vmem>>, %arg5: memref<1x32x96xf32, #tpu.memory_space<vmem>>, %arg6: memref<1x1x96xf32, #tpu.memory_space<vmem>>, %arg7: memref<1x32x32xf32, #tpu.memory_space<vmem>>, %arg8: memref<1x1x32xf32, #tpu.memory_space<vmem>>, %arg9: memref<1x1x32xf32, #tpu.memory_space<vmem>>, %arg10: memref<1x1x32xf32, #tpu.memory_space<vmem>>, %arg11: memref<1x32x128xf32, #tpu.memory_space<vmem>>, %arg12: memref<1x1x128xf32, #tpu.memory_space<vmem>>, %arg13: memref<1x128x32xf32, #tpu.memory_space<vmem>>, %arg14: memref<1x1x32xf32, #tpu.memory_space<vmem>>, %arg15: memref<1x1x32xf32, #tpu.memory_space<vmem>>, %arg16: memref<1x1x32xf32, #tpu.memory_space<vmem>>, %arg17: memref<32x32xf32, #tpu.memory_space<vmem>>, %arg18: memref<1x32xf32, #tpu.memory_space<vmem>>, %arg19: memref<32x2xf32, #tpu.memory_space<vmem>>, %arg20: memref<1x2xf32, #tpu.memory_space<vmem>>, %arg21: memref<2x2xf32, #tpu.memory_space<vmem>>, %arg22: memref<16x32xf32, #tpu.memory_space<vmem>>) attributes {dimension_semantics = [#tpu.dimension_semantics<arbitrary>], iteration_bounds = array<i64: 2>, scalar_prefetch = 0 : i64, scratch_operands = 1 : i64, tpu.core_type = #tpu.core_type<tc>, window_params = [{pipeline_mode = #tpu.pipeline_mode<synchronous>, transform_indices = @transform_0, window_bounds = array<i64: 16, 32>}, {pipeline_mode = #tpu.pipeline_mode<synchronous>, transform_indices = @transform_1, window_bounds = array<i64: 2, 8>}, {pipeline_mode = #tpu.pipeline_mode<synchronous>, transform_indices = @transform_2, window_bounds = array<i64: 1, 32>}, {pipeline_mode = #tpu.pipeline_mode<synchronous>, transform_indices = @transform_3, window_bounds = array<i64: 1, 32>}, {transform_indices = @transform_4, window_bounds = array<i64: 1, 32, 96>}, {transform_indices = @transform_5, window_bounds = array<i64: 1, 1, 96>}, {transform_indices = @transform_6, window_bounds = array<i64: 1, 32, 32>}, {transform_indices = @transform_7, window_bounds = array<i64: 1, 1, 32>}, {transform_indices = @transform_8, window_bounds = array<i64: 1, 1, 32>}, {transform_indices = @transform_9, window_bounds = array<i64: 1, 1, 32>}, {transform_indices = @transform_10, window_bounds = array<i64: 1, 32, 128>}, {transform_indices = @transform_11, window_bounds = array<i64: 1, 1, 128>}, {transform_indices = @transform_12, window_bounds = array<i64: 1, 128, 32>}, {transform_indices = @transform_13, window_bounds = array<i64: 1, 1, 32>}, {transform_indices = @transform_14, window_bounds = array<i64: 1, 1, 32>}, {transform_indices = @transform_15, window_bounds = array<i64: 1, 1, 32>}, {pipeline_mode = #tpu.pipeline_mode<synchronous>, transform_indices = @transform_16, window_bounds = array<i64: 32, 32>}, {pipeline_mode = #tpu.pipeline_mode<synchronous>, transform_indices = @transform_17, window_bounds = array<i64: 1, 32>}, {pipeline_mode = #tpu.pipeline_mode<synchronous>, transform_indices = @transform_18, window_bounds = array<i64: 32, 2>}, {pipeline_mode = #tpu.pipeline_mode<synchronous>, transform_indices = @transform_19, window_bounds = array<i64: 1, 2>}, {pipeline_mode = #tpu.pipeline_mode<synchronous>, transform_indices = @transform_20, window_bounds = array<i64: 2, 2>}]} {
    %c0_i32 = arith.constant 0 : i32
    %0 = arith.cmpi eq, %arg0, %c0_i32 : i32
    %1 = arith.extui %0 : i1 to i32
    %c0_i32_0 = arith.constant 0 : i32
    %2 = arith.cmpi ne, %1, %c0_i32_0 : i32
    scf.if %2 {
      %c0_73 = arith.constant 0 : index
      %c0_74 = arith.constant 0 : index
      %155 = vector.load %arg1[%c0_73, %c0_74] : memref<16x32xf32, #tpu.memory_space<vmem>>, vector<16x32xf32>
      %c0_75 = arith.constant 0 : index
      %c0_76 = arith.constant 0 : index
      %156 = vector.load %arg3[%c0_75, %c0_76] : memref<1x32xf32, #tpu.memory_space<vmem>>, vector<1x32xf32>
      %c0_77 = arith.constant 0 : index
      %c0_78 = arith.constant 0 : index
      %157 = vector.load %arg4[%c0_77, %c0_78] : memref<1x32xf32, #tpu.memory_space<vmem>>, vector<1x32xf32>
      %cst_79 = arith.constant dense<0.000000e+00> : vector<16xf32>
      %158 = vector.multi_reduction <add>, %155, %cst_79 [1] : vector<16x32xf32> to vector<16xf32>
      %159 = vector.shape_cast %158 : vector<16xf32> to vector<16x1xf32>
      %cst_80 = arith.constant 3.200000e+01 : f32
      %160 = vector.broadcast %cst_80 : f32 to vector<16x1xf32>
      %161 = arith.divf %159, %160 : vector<16x1xf32>
      %162 = vector.broadcast %161 : vector<16x1xf32> to vector<16x32xf32>
      %163 = arith.subf %155, %162 : vector<16x32xf32>
      %164 = arith.mulf %163, %163 : vector<16x32xf32>
      %cst_81 = arith.constant dense<0.000000e+00> : vector<16xf32>
      %165 = vector.multi_reduction <add>, %164, %cst_81 [1] : vector<16x32xf32> to vector<16xf32>
      %166 = vector.shape_cast %165 : vector<16xf32> to vector<16x1xf32>
      %cst_82 = arith.constant 3.200000e+01 : f32
      %167 = vector.broadcast %cst_82 : f32 to vector<16x1xf32>
      %168 = arith.divf %166, %167 : vector<16x1xf32>
      %169 = vector.broadcast %161 : vector<16x1xf32> to vector<16x32xf32>
      %170 = arith.subf %155, %169 : vector<16x32xf32>
      %cst_83 = arith.constant 9.99999996E-13 : f32
      %171 = vector.broadcast %cst_83 : f32 to vector<16x1xf32>
      %172 = arith.addf %168, %171 : vector<16x1xf32>
      %173 = math.rsqrt %172 : vector<16x1xf32>
      %174 = vector.broadcast %173 : vector<16x1xf32> to vector<16x32xf32>
      %175 = arith.mulf %170, %174 : vector<16x32xf32>
      %176 = vector.broadcast %156 : vector<1x32xf32> to vector<16x32xf32>
      %177 = arith.mulf %175, %176 : vector<16x32xf32>
      %178 = vector.broadcast %157 : vector<1x32xf32> to vector<16x32xf32>
      %179 = arith.addf %177, %178 : vector<16x32xf32>
      %c0_84 = arith.constant 0 : index
      %c0_85 = arith.constant 0 : index
      %180 = vector.load %arg22[%c0_84, %c0_85] : memref<16x32xf32, #tpu.memory_space<vmem>>, vector<16x32xf32>
      tpu.vector_store %arg22[%c0_84, %c0_85], %179 {strides = array<i32>} : memref<16x32xf32, #tpu.memory_space<vmem>>, vector<16x32xf32>,
    } else {
    }
    %c0 = arith.constant 0 : index
    %c0_1 = arith.constant 0 : index
    %3 = vector.load %arg22[%c0, %c0_1] : memref<16x32xf32, #tpu.memory_space<vmem>>, vector<16x32xf32>
    %c0_2 = arith.constant 0 : index
    %c0_3 = arith.constant 0 : index
    %c0_4 = arith.constant 0 : index
    %4 = vector.load %arg5[%c0_2, %c0_3, %c0_4] : memref<1x32x96xf32, #tpu.memory_space<vmem>>, vector<1x32x96xf32>
    %5 = vector.shape_cast %4 : vector<1x32x96xf32> to vector<32x96xf32>
    %cst = arith.constant dense<0.000000e+00> : vector<16x96xf32>
    %6 = tpu.matmul %3, %5, %cst {dimension_numbers = #tpu.dot_dimension_numbers<[1], [0], [0], [1], [0, 0, 1, 1], [], []>} : vector<16x32xf32>, vector<32x96xf32>, vector<16x96xf32> -> vector<16x96xf32>
    %c0_5 = arith.constant 0 : index
    %c0_6 = arith.constant 0 : index
    %c0_7 = arith.constant 0 : index
    %7 = vector.load %arg6[%c0_5, %c0_6, %c0_7] : memref<1x1x96xf32, #tpu.memory_space<vmem>>, vector<1x1x96xf32>
    %8 = vector.shape_cast %7 : vector<1x1x96xf32> to vector<1x96xf32>
    %9 = vector.broadcast %8 : vector<1x96xf32> to vector<16x96xf32>
    %10 = arith.addf %6, %9 : vector<16x96xf32>
    %11 = vector.extract_strided_slice %10 {offsets = [0, 0], sizes = [16, 32], strides = [1, 1]} : vector<16x96xf32> to vector<16x32xf32>
    %cst_8 = arith.constant 2.500000e-01 : f32
    %12 = vector.broadcast %cst_8 : f32 to vector<16x32xf32>
    %13 = arith.mulf %11, %12 : vector<16x32xf32>
    %14 = vector.shape_cast %13 : vector<16x32xf32> to vector<2x8x32xf32>
    %15 = vector.extract_strided_slice %10 {offsets = [0, 32], sizes = [16, 32], strides = [1, 1]} : vector<16x96xf32> to vector<16x32xf32>
    %16 = vector.shape_cast %15 : vector<16x32xf32> to vector<2x8x32xf32>
    %17 = vector.extract_strided_slice %10 {offsets = [0, 64], sizes = [16, 32], strides = [1, 1]} : vector<16x96xf32> to vector<16x32xf32>
    %18 = vector.shape_cast %17 : vector<16x32xf32> to vector<2x8x32xf32>
    %c0_9 = arith.constant 0 : index
    %c0_10 = arith.constant 0 : index
    %19 = vector.load %arg2[%c0_9, %c0_10] : memref<2x8xf32, #tpu.memory_space<vmem>>, vector<2x8xf32>
    %20 = vector.shape_cast %19 : vector<2x8xf32> to vector<2x1x8xf32>
    %cst_11 = arith.constant 0.000000e+00 : f32
    %21 = vector.broadcast %cst_11 : f32 to vector<16x32xf32>
    %22 = vector.extract_strided_slice %14 {offsets = [0, 0, 0], sizes = [2, 8, 16], strides = [1, 1, 1]} : vector<2x8x32xf32> to vector<2x8x16xf32>
    %23 = vector.extract_strided_slice %16 {offsets = [0, 0, 0], sizes = [2, 8, 16], strides = [1, 1, 1]} : vector<2x8x32xf32> to vector<2x8x16xf32>
    %24 = vector.extract_strided_slice %18 {offsets = [0, 0, 0], sizes = [2, 8, 16], strides = [1, 1, 1]} : vector<2x8x32xf32> to vector<2x8x16xf32>
    "tpu.trace_start"() <{level = 10 : i32, message = "bqd,bkd->bqk"}> : () -> ()
    %cst_12 = arith.constant dense<0.000000e+00> : vector<2x8x8xf32>
    %25 = tpu.matmul %22, %23, %cst_12 {dimension_numbers = #tpu.dot_dimension_numbers<[2], [2], [1], [1], [0, 0, 0, 1, 1, 1], [0], [0]>} : vector<2x8x16xf32>, vector<2x8x16xf32>, vector<2x8x8xf32> -> vector<2x8x8xf32>
    "tpu.trace_stop"() : () -> ()
    %26 = vector.broadcast %20 : vector<2x1x8xf32> to vector<2x8x8xf32>
    %27 = arith.addf %25, %26 : vector<2x8x8xf32>
    %cst_13 = arith.constant dense<0xFF800000> : vector<2x8xf32>
    %28 = vector.multi_reduction <maximumf>, %27, %cst_13 [2] : vector<2x8x8xf32> to vector<2x8xf32>
    %29 = vector.shape_cast %28 : vector<2x8xf32> to vector<2x8x1xf32>
    %30 = vector.broadcast %29 : vector<2x8x1xf32> to vector<2x8x8xf32>
    %31 = arith.subf %27, %30 : vector<2x8x8xf32>
    %32 = math.exp %31 : vector<2x8x8xf32>
    %cst_14 = arith.constant dense<0.000000e+00> : vector<2x8xf32>
    %33 = vector.multi_reduction <add>, %32, %cst_14 [2] : vector<2x8x8xf32> to vector<2x8xf32>
    %34 = vector.shape_cast %33 : vector<2x8xf32> to vector<2x8x1xf32>
    %35 = tpu.reciprocal %34 {approx = true} : vector<2x8x1xf32> -> vector<2x8x1xf32>
    %36 = vector.broadcast %35 : vector<2x8x1xf32> to vector<2x8x8xf32>
    %37 = arith.mulf %32, %36 : vector<2x8x8xf32>
    "tpu.trace_start"() <{level = 10 : i32, message = "bqk,bkd->bqd"}> : () -> ()
    %cst_15 = arith.constant dense<0.000000e+00> : vector<2x8x16xf32>
    %38 = tpu.matmul %37, %24, %cst_15 {dimension_numbers = #tpu.dot_dimension_numbers<[2], [1], [1], [2], [0, 0, 0, 1, 1, 2], [0], [0]>} : vector<2x8x8xf32>, vector<2x8x16xf32>, vector<2x8x16xf32> -> vector<2x8x16xf32>
    "tpu.trace_stop"() : () -> ()
    %39 = vector.shape_cast %38 : vector<2x8x16xf32> to vector<16x16xf32>
    %c0_16 = arith.constant 0 : index
    %c0_17 = arith.constant 0 : index
    %c0_18 = arith.constant 0 : index
    %40 = vector.load %arg7[%c0_16, %c0_17, %c0_18] : memref<1x32x32xf32, #tpu.memory_space<vmem>>, vector<1x16x32xf32>
    %41 = vector.shape_cast %40 : vector<1x16x32xf32> to vector<16x32xf32>
    %cst_19 = arith.constant dense<0.000000e+00> : vector<16x32xf32>
    %42 = tpu.matmul %39, %41, %cst_19 {dimension_numbers = #tpu.dot_dimension_numbers<[1], [0], [0], [1], [0, 0, 1, 1], [], []>} : vector<16x16xf32>, vector<16x32xf32>, vector<16x32xf32> -> vector<16x32xf32>
    %43 = arith.addf %21, %42 : vector<16x32xf32>
    %44 = vector.extract_strided_slice %14 {offsets = [0, 0, 16], sizes = [2, 8, 16], strides = [1, 1, 1]} : vector<2x8x32xf32> to vector<2x8x16xf32>
    %45 = vector.extract_strided_slice %16 {offsets = [0, 0, 16], sizes = [2, 8, 16], strides = [1, 1, 1]} : vector<2x8x32xf32> to vector<2x8x16xf32>
    %46 = vector.extract_strided_slice %18 {offsets = [0, 0, 16], sizes = [2, 8, 16], strides = [1, 1, 1]} : vector<2x8x32xf32> to vector<2x8x16xf32>
    "tpu.trace_start"() <{level = 10 : i32, message = "bqd,bkd->bqk"}> : () -> ()
    %cst_20 = arith.constant dense<0.000000e+00> : vector<2x8x8xf32>
    %47 = tpu.matmul %44, %45, %cst_20 {dimension_numbers = #tpu.dot_dimension_numbers<[2], [2], [1], [1], [0, 0, 0, 1, 1, 1], [0], [0]>} : vector<2x8x16xf32>, vector<2x8x16xf32>, vector<2x8x8xf32> -> vector<2x8x8xf32>
    "tpu.trace_stop"() : () -> ()
    %48 = vector.broadcast %20 : vector<2x1x8xf32> to vector<2x8x8xf32>
    %49 = arith.addf %47, %48 : vector<2x8x8xf32>
    %cst_21 = arith.constant dense<0xFF800000> : vector<2x8xf32>
    %50 = vector.multi_reduction <maximumf>, %49, %cst_21 [2] : vector<2x8x8xf32> to vector<2x8xf32>
    %51 = vector.shape_cast %50 : vector<2x8xf32> to vector<2x8x1xf32>
    %52 = vector.broadcast %51 : vector<2x8x1xf32> to vector<2x8x8xf32>
    %53 = arith.subf %49, %52 : vector<2x8x8xf32>
    %54 = math.exp %53 : vector<2x8x8xf32>
    %cst_22 = arith.constant dense<0.000000e+00> : vector<2x8xf32>
    %55 = vector.multi_reduction <add>, %54, %cst_22 [2] : vector<2x8x8xf32> to vector<2x8xf32>
    %56 = vector.shape_cast %55 : vector<2x8xf32> to vector<2x8x1xf32>
    %57 = tpu.reciprocal %56 {approx = true} : vector<2x8x1xf32> -> vector<2x8x1xf32>
    %58 = vector.broadcast %57 : vector<2x8x1xf32> to vector<2x8x8xf32>
    %59 = arith.mulf %54, %58 : vector<2x8x8xf32>
    "tpu.trace_start"() <{level = 10 : i32, message = "bqk,bkd->bqd"}> : () -> ()
    %cst_23 = arith.constant dense<0.000000e+00> : vector<2x8x16xf32>
    %60 = tpu.matmul %59, %46, %cst_23 {dimension_numbers = #tpu.dot_dimension_numbers<[2], [1], [1], [2], [0, 0, 0, 1, 1, 2], [0], [0]>} : vector<2x8x8xf32>, vector<2x8x16xf32>, vector<2x8x16xf32> -> vector<2x8x16xf32>
    "tpu.trace_stop"() : () -> ()
    %61 = vector.shape_cast %60 : vector<2x8x16xf32> to vector<16x16xf32>
    %c0_24 = arith.constant 0 : index
    %c16 = arith.constant 16 : index
    %c0_25 = arith.constant 0 : index
    %62 = vector.load %arg7[%c0_24, %c16, %c0_25] : memref<1x32x32xf32, #tpu.memory_space<vmem>>, vector<1x16x32xf32>
    %63 = vector.shape_cast %62 : vector<1x16x32xf32> to vector<16x32xf32>
    %cst_26 = arith.constant dense<0.000000e+00> : vector<16x32xf32>
    %64 = tpu.matmul %61, %63, %cst_26 {dimension_numbers = #tpu.dot_dimension_numbers<[1], [0], [0], [1], [0, 0, 1, 1], [], []>} : vector<16x16xf32>, vector<16x32xf32>, vector<16x32xf32> -> vector<16x32xf32>
    %65 = arith.addf %43, %64 : vector<16x32xf32>
    %c0_27 = arith.constant 0 : index
    %c0_28 = arith.constant 0 : index
    %c0_29 = arith.constant 0 : index
    %66 = vector.load %arg8[%c0_27, %c0_28, %c0_29] : memref<1x1x32xf32, #tpu.memory_space<vmem>>, vector<1x1x32xf32>
    %67 = vector.shape_cast %66 : vector<1x1x32xf32> to vector<1x32xf32>
    %68 = vector.broadcast %67 : vector<1x32xf32> to vector<16x32xf32>
    %69 = arith.addf %65, %68 : vector<16x32xf32>
    %70 = arith.addf %3, %69 : vector<16x32xf32>
    %c0_30 = arith.constant 0 : index
    %c0_31 = arith.constant 0 : index
    %c0_32 = arith.constant 0 : index
    %71 = vector.load %arg9[%c0_30, %c0_31, %c0_32] : memref<1x1x32xf32, #tpu.memory_space<vmem>>, vector<1x1x32xf32>
    %72 = vector.shape_cast %71 : vector<1x1x32xf32> to vector<1x32xf32>
    %c0_33 = arith.constant 0 : index
    %c0_34 = arith.constant 0 : index
    %c0_35 = arith.constant 0 : index
    %73 = vector.load %arg10[%c0_33, %c0_34, %c0_35] : memref<1x1x32xf32, #tpu.memory_space<vmem>>, vector<1x1x32xf32>
    %74 = vector.shape_cast %73 : vector<1x1x32xf32> to vector<1x32xf32>
    %cst_36 = arith.constant dense<0.000000e+00> : vector<16xf32>
    %75 = vector.multi_reduction <add>, %70, %cst_36 [1] : vector<16x32xf32> to vector<16xf32>
    %76 = vector.shape_cast %75 : vector<16xf32> to vector<16x1xf32>
    %cst_37 = arith.constant 3.200000e+01 : f32
    %77 = vector.broadcast %cst_37 : f32 to vector<16x1xf32>
    %78 = arith.divf %76, %77 : vector<16x1xf32>
    %79 = vector.broadcast %78 : vector<16x1xf32> to vector<16x32xf32>
    %80 = arith.subf %70, %79 : vector<16x32xf32>
    %81 = arith.mulf %80, %80 : vector<16x32xf32>
    %cst_38 = arith.constant dense<0.000000e+00> : vector<16xf32>
    %82 = vector.multi_reduction <add>, %81, %cst_38 [1] : vector<16x32xf32> to vector<16xf32>
    %83 = vector.shape_cast %82 : vector<16xf32> to vector<16x1xf32>
    %cst_39 = arith.constant 3.200000e+01 : f32
    %84 = vector.broadcast %cst_39 : f32 to vector<16x1xf32>
    %85 = arith.divf %83, %84 : vector<16x1xf32>
    %86 = vector.broadcast %78 : vector<16x1xf32> to vector<16x32xf32>
    %87 = arith.subf %70, %86 : vector<16x32xf32>
    %cst_40 = arith.constant 9.99999996E-13 : f32
    %88 = vector.broadcast %cst_40 : f32 to vector<16x1xf32>
    %89 = arith.addf %85, %88 : vector<16x1xf32>
    %90 = math.rsqrt %89 : vector<16x1xf32>
    %91 = vector.broadcast %90 : vector<16x1xf32> to vector<16x32xf32>
    %92 = arith.mulf %87, %91 : vector<16x32xf32>
    %93 = vector.broadcast %72 : vector<1x32xf32> to vector<16x32xf32>
    %94 = arith.mulf %92, %93 : vector<16x32xf32>
    %95 = vector.broadcast %74 : vector<1x32xf32> to vector<16x32xf32>
    %96 = arith.addf %94, %95 : vector<16x32xf32>
    %c0_41 = arith.constant 0 : index
    %c0_42 = arith.constant 0 : index
    %c0_43 = arith.constant 0 : index
    %97 = vector.load %arg11[%c0_41, %c0_42, %c0_43] : memref<1x32x128xf32, #tpu.memory_space<vmem>>, vector<1x32x128xf32>
    %98 = vector.shape_cast %97 : vector<1x32x128xf32> to vector<32x128xf32>
    %cst_44 = arith.constant dense<0.000000e+00> : vector<16x128xf32>
    %99 = tpu.matmul %96, %98, %cst_44 {dimension_numbers = #tpu.dot_dimension_numbers<[1], [0], [0], [1], [0, 0, 1, 1], [], []>} : vector<16x32xf32>, vector<32x128xf32>, vector<16x128xf32> -> vector<16x128xf32>
    %c0_45 = arith.constant 0 : index
    %c0_46 = arith.constant 0 : index
    %c0_47 = arith.constant 0 : index
    %100 = vector.load %arg12[%c0_45, %c0_46, %c0_47] : memref<1x1x128xf32, #tpu.memory_space<vmem>>, vector<1x1x128xf32>
    %101 = vector.shape_cast %100 : vector<1x1x128xf32> to vector<1x128xf32>
    %102 = vector.broadcast %101 : vector<1x128xf32> to vector<16x128xf32>
    %103 = arith.addf %99, %102 : vector<16x128xf32>
    %cst_48 = arith.constant 5.000000e-01 : f32
    %104 = vector.broadcast %cst_48 : f32 to vector<16x128xf32>
    %105 = arith.mulf %104, %103 : vector<16x128xf32>
    %cst_49 = arith.constant 4.471500e-02 : f32
    %106 = vector.broadcast %cst_49 : f32 to vector<16x128xf32>
    %107 = arith.mulf %106, %103 : vector<16x128xf32>
    %108 = arith.mulf %107, %103 : vector<16x128xf32>
    %109 = arith.mulf %108, %103 : vector<16x128xf32>
    %110 = arith.addf %103, %109 : vector<16x128xf32>
    %cst_50 = arith.constant 0.797884583 : f32
    %111 = vector.broadcast %cst_50 : f32 to vector<16x128xf32>
    %112 = arith.mulf %111, %110 : vector<16x128xf32>
    %113 = math.tanh %112 : vector<16x128xf32>
    %cst_51 = arith.constant 1.000000e+00 : f32
    %114 = vector.broadcast %cst_51 : f32 to vector<16x128xf32>
    %115 = arith.addf %114, %113 : vector<16x128xf32>
    %116 = arith.mulf %105, %115 : vector<16x128xf32>
    %c0_52 = arith.constant 0 : index
    %c0_53 = arith.constant 0 : index
    %c0_54 = arith.constant 0 : index
    %117 = vector.load %arg13[%c0_52, %c0_53, %c0_54] : memref<1x128x32xf32, #tpu.memory_space<vmem>>, vector<1x128x32xf32>
    %118 = vector.shape_cast %117 : vector<1x128x32xf32> to vector<128x32xf32>
    %cst_55 = arith.constant dense<0.000000e+00> : vector<16x32xf32>
    %119 = tpu.matmul %116, %118, %cst_55 {dimension_numbers = #tpu.dot_dimension_numbers<[1], [0], [0], [1], [0, 0, 1, 1], [], []>} : vector<16x128xf32>, vector<128x32xf32>, vector<16x32xf32> -> vector<16x32xf32>
    %c0_56 = arith.constant 0 : index
    %c0_57 = arith.constant 0 : index
    %c0_58 = arith.constant 0 : index
    %120 = vector.load %arg14[%c0_56, %c0_57, %c0_58] : memref<1x1x32xf32, #tpu.memory_space<vmem>>, vector<1x1x32xf32>
    %121 = vector.shape_cast %120 : vector<1x1x32xf32> to vector<1x32xf32>
    %122 = vector.broadcast %121 : vector<1x32xf32> to vector<16x32xf32>
    %123 = arith.addf %119, %122 : vector<16x32xf32>
    %124 = arith.addf %96, %123 : vector<16x32xf32>
    %c0_59 = arith.constant 0 : index
    %c0_60 = arith.constant 0 : index
    %c0_61 = arith.constant 0 : index
    %125 = vector.load %arg15[%c0_59, %c0_60, %c0_61] : memref<1x1x32xf32, #tpu.memory_space<vmem>>, vector<1x1x32xf32>
    %126 = vector.shape_cast %125 : vector<1x1x32xf32> to vector<1x32xf32>
    %c0_62 = arith.constant 0 : index
    %c0_63 = arith.constant 0 : index
    %c0_64 = arith.constant 0 : index
    %127 = vector.load %arg16[%c0_62, %c0_63, %c0_64] : memref<1x1x32xf32, #tpu.memory_space<vmem>>, vector<1x1x32xf32>
    %128 = vector.shape_cast %127 : vector<1x1x32xf32> to vector<1x32xf32>
    %cst_65 = arith.constant dense<0.000000e+00> : vector<16xf32>
    %129 = vector.multi_reduction <add>, %124, %cst_65 [1] : vector<16x32xf32> to vector<16xf32>
    %130 = vector.shape_cast %129 : vector<16xf32> to vector<16x1xf32>
    %cst_66 = arith.constant 3.200000e+01 : f32
    %131 = vector.broadcast %cst_66 : f32 to vector<16x1xf32>
    %132 = arith.divf %130, %131 : vector<16x1xf32>
    %133 = vector.broadcast %132 : vector<16x1xf32> to vector<16x32xf32>
    %134 = arith.subf %124, %133 : vector<16x32xf32>
    %135 = arith.mulf %134, %134 : vector<16x32xf32>
    %cst_67 = arith.constant dense<0.000000e+00> : vector<16xf32>
    %136 = vector.multi_reduction <add>, %135, %cst_67 [1] : vector<16x32xf32> to vector<16xf32>
    %137 = vector.shape_cast %136 : vector<16xf32> to vector<16x1xf32>
    %cst_68 = arith.constant 3.200000e+01 : f32
    %138 = vector.broadcast %cst_68 : f32 to vector<16x1xf32>
    %139 = arith.divf %137, %138 : vector<16x1xf32>
    %140 = vector.broadcast %132 : vector<16x1xf32> to vector<16x32xf32>
    %141 = arith.subf %124, %140 : vector<16x32xf32>
    %cst_69 = arith.constant 9.99999996E-13 : f32
    %142 = vector.broadcast %cst_69 : f32 to vector<16x1xf32>
    %143 = arith.addf %139, %142 : vector<16x1xf32>
    %144 = math.rsqrt %143 : vector<16x1xf32>
    %145 = vector.broadcast %144 : vector<16x1xf32> to vector<16x32xf32>
    %146 = arith.mulf %141, %145 : vector<16x32xf32>
    %147 = vector.broadcast %126 : vector<1x32xf32> to vector<16x32xf32>
    %148 = arith.mulf %146, %147 : vector<16x32xf32>
    %149 = vector.broadcast %128 : vector<1x32xf32> to vector<16x32xf32>
    %150 = arith.addf %148, %149 : vector<16x32xf32>
    %c0_70 = arith.constant 0 : index
    %c0_71 = arith.constant 0 : index
    %151 = vector.load %arg22[%c0_70, %c0_71] : memref<16x32xf32, #tpu.memory_space<vmem>>, vector<16x32xf32>
    tpu.vector_store %arg22[%c0_70, %c0_71], %150 {strides = array<i32>} : memref<16x32xf32, #tpu.memory_space<vmem>>, vector<16x32xf32>,
    %c1_i32 = arith.constant 1 : i32
    %152 = arith.cmpi eq, %arg0, %c1_i32 : i32
    %153 = arith.extui %152 : i1 to i32
    %c0_i32_72 = arith.constant 0 : i32
    %154 = arith.cmpi ne, %153, %c0_i32_72 : i32
    scf.if %154 {
      %155 = vector.shape_cast %150 : vector<16x32xf32> to vector<2x8x32xf32>
      %156 = vector.extract_strided_slice %155 {offsets = [0, 0, 0], sizes = [2, 1, 32], strides = [1, 1, 1]} : vector<2x8x32xf32> to vector<2x1x32xf32>
      %157 = vector.shape_cast %156 : vector<2x1x32xf32> to vector<2x32xf32>
      %c0_73 = arith.constant 0 : index
      %c0_74 = arith.constant 0 : index
      %158 = vector.load %arg17[%c0_73, %c0_74] : memref<32x32xf32, #tpu.memory_space<vmem>>, vector<32x32xf32>
      %cst_75 = arith.constant dense<0.000000e+00> : vector<2x32xf32>
      %159 = tpu.matmul %157, %158, %cst_75 {dimension_numbers = #tpu.dot_dimension_numbers<[1], [0], [0], [1], [0, 0, 1, 1], [], []>} : vector<2x32xf32>, vector<32x32xf32>, vector<2x32xf32> -> vector<2x32xf32>
      %c0_76 = arith.constant 0 : index
      %c0_77 = arith.constant 0 : index
      %160 = vector.load %arg18[%c0_76, %c0_77] : memref<1x32xf32, #tpu.memory_space<vmem>>, vector<1x32xf32>
      %161 = vector.broadcast %160 : vector<1x32xf32> to vector<2x32xf32>
      %162 = arith.addf %159, %161 : vector<2x32xf32>
      %163 = math.tanh %162 : vector<2x32xf32>
      %c0_78 = arith.constant 0 : index
      %c0_79 = arith.constant 0 : index
      %164 = vector.load %arg19[%c0_78, %c0_79] : memref<32x2xf32, #tpu.memory_space<vmem>>, vector<32x2xf32>
      %cst_80 = arith.constant dense<0.000000e+00> : vector<2x2xf32>
      %165 = tpu.matmul %163, %164, %cst_80 {dimension_numbers = #tpu.dot_dimension_numbers<[1], [0], [0], [1], [0, 0, 1, 1], [], []>} : vector<2x32xf32>, vector<32x2xf32>, vector<2x2xf32> -> vector<2x2xf32>
      %c0_81 = arith.constant 0 : index
      %c0_82 = arith.constant 0 : index
      %166 = vector.load %arg20[%c0_81, %c0_82] : memref<1x2xf32, #tpu.memory_space<vmem>>, vector<1x2xf32>
      %167 = vector.broadcast %166 : vector<1x2xf32> to vector<2x2xf32>
      %168 = arith.addf %165, %167 : vector<2x2xf32>
      %c0_83 = arith.constant 0 : index
      %c0_84 = arith.constant 0 : index
      %169 = vector.load %arg21[%c0_83, %c0_84] : memref<2x2xf32, #tpu.memory_space<vmem>>, vector<2x2xf32>
      tpu.vector_store %arg21[%c0_83, %c0_84], %168 {strides = array<i32>} : memref<2x2xf32, #tpu.memory_space<vmem>>, vector<2x2xf32>,
    } else {
    }
    return
  }
  func.func @transform_0(%arg0: i32) -> (i32, i32) {
    %c0_i32 = arith.constant 0 : i32
    %c0_i32_0 = arith.constant 0 : i32
    %c0_i32_1 = arith.constant 0 : i32
    return %c0_i32, %c0_i32_0 : i32, i32
  }
  func.func @transform_1(%arg0: i32) -> (i32, i32) {
    %c0_i32 = arith.constant 0 : i32
    %c0_i32_0 = arith.constant 0 : i32
    %c0_i32_1 = arith.constant 0 : i32
    return %c0_i32, %c0_i32_0 : i32, i32
  }
  func.func @transform_2(%arg0: i32) -> (i32, i32) {
    %c0_i32 = arith.constant 0 : i32
    %c0_i32_0 = arith.constant 0 : i32
    %c0_i32_1 = arith.constant 0 : i32
    return %c0_i32, %c0_i32_0 : i32, i32
  }
  func.func @transform_3(%arg0: i32) -> (i32, i32) {
    %c0_i32 = arith.constant 0 : i32
    %c0_i32_0 = arith.constant 0 : i32
    %c0_i32_1 = arith.constant 0 : i32
    return %c0_i32, %c0_i32_0 : i32, i32
  }
  func.func @transform_4(%arg0: i32) -> (i32, i32, i32) {
    %c0_i32 = arith.constant 0 : i32
    %c0_i32_0 = arith.constant 0 : i32
    %c0_i32_1 = arith.constant 0 : i32
    return %arg0, %c0_i32, %c0_i32_0 : i32, i32, i32
  }
  func.func @transform_5(%arg0: i32) -> (i32, i32, i32) {
    %c0_i32 = arith.constant 0 : i32
    %c0_i32_0 = arith.constant 0 : i32
    %c0_i32_1 = arith.constant 0 : i32
    return %arg0, %c0_i32, %c0_i32_0 : i32, i32, i32
  }
  func.func @transform_6(%arg0: i32) -> (i32, i32, i32) {
    %c0_i32 = arith.constant 0 : i32
    %c0_i32_0 = arith.constant 0 : i32
    %c0_i32_1 = arith.constant 0 : i32
    return %arg0, %c0_i32, %c0_i32_0 : i32, i32, i32
  }
  func.func @transform_7(%arg0: i32) -> (i32, i32, i32) {
    %c0_i32 = arith.constant 0 : i32
    %c0_i32_0 = arith.constant 0 : i32
    %c0_i32_1 = arith.constant 0 : i32
    return %arg0, %c0_i32, %c0_i32_0 : i32, i32, i32
  }
  func.func @transform_8(%arg0: i32) -> (i32, i32, i32) {
    %c0_i32 = arith.constant 0 : i32
    %c0_i32_0 = arith.constant 0 : i32
    %c0_i32_1 = arith.constant 0 : i32
    return %arg0, %c0_i32, %c0_i32_0 : i32, i32, i32
  }
  func.func @transform_9(%arg0: i32) -> (i32, i32, i32) {
    %c0_i32 = arith.constant 0 : i32
    %c0_i32_0 = arith.constant 0 : i32
    %c0_i32_1 = arith.constant 0 : i32
    return %arg0, %c0_i32, %c0_i32_0 : i32, i32, i32
  }
  func.func @transform_10(%arg0: i32) -> (i32, i32, i32) {
    %c0_i32 = arith.constant 0 : i32
    %c0_i32_0 = arith.constant 0 : i32
    %c0_i32_1 = arith.constant 0 : i32
    return %arg0, %c0_i32, %c0_i32_0 : i32, i32, i32
  }
  func.func @transform_11(%arg0: i32) -> (i32, i32, i32) {
    %c0_i32 = arith.constant 0 : i32
    %c0_i32_0 = arith.constant 0 : i32
    %c0_i32_1 = arith.constant 0 : i32
    return %arg0, %c0_i32, %c0_i32_0 : i32, i32, i32
  }
  func.func @transform_12(%arg0: i32) -> (i32, i32, i32) {
    %c0_i32 = arith.constant 0 : i32
    %c0_i32_0 = arith.constant 0 : i32
    %c0_i32_1 = arith.constant 0 : i32
    return %arg0, %c0_i32, %c0_i32_0 : i32, i32, i32
  }
  func.func @transform_13(%arg0: i32) -> (i32, i32, i32) {
    %c0_i32 = arith.constant 0 : i32
    %c0_i32_0 = arith.constant 0 : i32
    %c0_i32_1 = arith.constant 0 : i32
    return %arg0, %c0_i32, %c0_i32_0 : i32, i32, i32
  }
  func.func @transform_14(%arg0: i32) -> (i32, i32, i32) {
    %c0_i32 = arith.constant 0 : i32
    %c0_i32_0 = arith.constant 0 : i32
    %c0_i32_1 = arith.constant 0 : i32
    return %arg0, %c0_i32, %c0_i32_0 : i32, i32, i32
  }
  func.func @transform_15(%arg0: i32) -> (i32, i32, i32) {
    %c0_i32 = arith.constant 0 : i32
    %c0_i32_0 = arith.constant 0 : i32
    %c0_i32_1 = arith.constant 0 : i32
    return %arg0, %c0_i32, %c0_i32_0 : i32, i32, i32
  }
  func.func @transform_16(%arg0: i32) -> (i32, i32) {
    %c0_i32 = arith.constant 0 : i32
    %c0_i32_0 = arith.constant 0 : i32
    %c0_i32_1 = arith.constant 0 : i32
    return %c0_i32, %c0_i32_0 : i32, i32
  }
  func.func @transform_17(%arg0: i32) -> (i32, i32) {
    %c0_i32 = arith.constant 0 : i32
    %c0_i32_0 = arith.constant 0 : i32
    %c0_i32_1 = arith.constant 0 : i32
    return %c0_i32, %c0_i32_0 : i32, i32
  }
  func.func @transform_18(%arg0: i32) -> (i32, i32) {
    %c0_i32 = arith.constant 0 : i32
    %c0_i32_0 = arith.constant 0 : i32
    %c0_i32_1 = arith.constant 0 : i32
    return %c0_i32, %c0_i32_0 : i32, i32
  }
  func.func @transform_19(%arg0: i32) -> (i32, i32) {
    %c0_i32 = arith.constant 0 : i32
    %c0_i32_0 = arith.constant 0 : i32
    %c0_i32_1 = arith.constant 0 : i32
    return %c0_i32, %c0_i32_0 : i32, i32
  }
  func.func @transform_20(%arg0: i32) -> (i32, i32) {
    %c0_i32 = arith.constant 0 : i32
    %c0_i32_0 = arith.constant 0 : i32
    %c0_i32_1 = arith.constant 0 : i32
    return %c0_i32, %c0_i32_0 : i32, i32
  }
}

</mosaic_0001>

<bundles_post_ra>
// kernel: bert_classifier_forward.1
= control target key start
LH: loop header
LB: loop body
LE: loop exit
PB: predicated region body
PF: predicated region fallthrough
CT: control target
= control target key end

     0   :  { %s2237_s0 = inlined_call_operand.vmem [shape: f32[16,32], index: 0, kind: input, shape index: {}]   ;;  %s2238_s1 = inlined_call_operand.vmem [shape: f32[2,8], index: 1, kind: input, shape index: {}]   ;;  %s2239_s2 = inlined_call_operand.vmem [shape: f32[1,32], index: 2, kind: input, shape index: {}]   ;;  %s2240_s3 = inlined_call_operand.vmem [shape: f32[1,32], index: 3, kind: input, shape index: {}]   ;;  %s2241_s4 = inlined_call_operand.vmem [shape: f32[2,32,96], index: 4, kind: input, shape index: {}]   ;;  %s2242_s5 = inlined_call_operand.vmem [shape: f32[2,1,96], index: 5, kind: input, shape index: {}]   ;;  %s2243_s6 = inlined_call_operand.vmem [shape: f32[2,32,32], index: 6, kind: input, shape index: {}]   ;;  %s2244_s7 = inlined_call_operand.vmem [shape: f32[2,1,32], index: 7, kind: input, shape index: {}]   ;;  %s2245_s8 = inlined_call_operand.vmem [shape: f32[2,1,32], index: 8, kind: input, shape index: {}]   ;;  %s2246_s9 = inlined_call_operand.vmem [shape: f32[2,1,32], index: 9, kind: input, shape index: {}]   ;;  %s2247_s10 = inlined_call_operand.vmem [shape: f32[2,32,128], index: 10, kind: input, shape index: {}]   ;;  %s2248_s11 = inlined_call_operand.vmem [shape: f32[2,1,128], index: 11, kind: input, shape index: {}]   ;;  %s2249_s12 = inlined_call_operand.vmem [shape: f32[2,128,32], index: 12, kind: input, shape index: {}]   ;;  %s2250_s13 = inlined_call_operand.vmem [shape: f32[2,1,32], index: 13, kind: input, shape index: {}]   ;;  %s2251_s14 = inlined_call_operand.vmem [shape: f32[2,1,32], index: 14, kind: input, shape index: {}]   ;;  %s2252_s15 = inlined_call_operand.vmem [shape: f32[2,1,32], index: 15, kind: input, shape index: {}]   ;;  %s2253_s16 = inlined_call_operand.vmem [shape: f32[32,32], index: 16, kind: input, shape index: {}]   ;;  %s2254_s17 = inlined_call_operand.vmem [shape: f32[1,32], index: 17, kind: input, shape index: {}]   ;;  %s2255_s18 = inlined_call_operand.vmem [shape: f32[32,2], index: 18, kind: input, shape index: {}]   ;;  %s2256_s19 = inlined_call_operand.vmem [shape: f32[1,2], index: 19, kind: input, shape index: {}]   ;;  %s2257_s20 = inlined_call_operand.hbm [shape: f32[2,2], index: 20, kind: output, shape index: {}]  }
   0x1   :  { %2262 = sst [smem:[#allocation7_spill]] %s2237_s0 }
   0x2   :  { %2263 = sst [smem:[#allocation8_spill]] %s2238_s1 }
   0x3   :  { %2264 = sst [smem:[#allocation9_spill]] %s2239_s2 }
   0x4   :  { %2265 = sst [smem:[#allocation10_spill]] %s2240_s3 }
   0x5   :  { %2266 = sst [smem:[#allocation11_spill]] %s2241_s4 }
   0x6   :  { %2267 = sst [smem:[#allocation12_spill]] %s2243_s6 }
   0x7   :  { %2268 = sst [smem:[#allocation13_spill]] %s2253_s16 }
   0x8   :  { %2269 = sst [smem:[#allocation14_spill]] %s2254_s17 }
   0x9   :  { %2270 = sst [smem:[#allocation15_spill]] %s2255_s18 }
   0xa   :  { %2271 = sst [smem:[#allocation16_spill]] %s2256_s19 }
   0xb   :  { %2272 = sst [smem:[#allocation17_spill]] %s2257_s20 }
   0xc   :  { %25 = vsyncpa [#allocation4], 0  ;;  %s1965_s1 = smov 0  }
   0xd LB: > { %2273 = sst [smem:[#allocation6_spill]] %s1850_s1  ;;  %s1971_s22 = sadd.s32 4294967295, %s1850_s1   ;;  %s1850_s1 = sphi %s1965_s1, %s31_s1  }
   0xe   : > { %p1694_p0 = scmp.ge.s32.totalorder %s1850_s1, 1  ;;  %p652_p1 = scmp.lt.s32.totalorder %s1850_s1, 3 }
  0x10   : > { %p653_p2 = pnand %p1694_p0, %p652_p1 }
  0x11   : > { %p744_p3 = scmp.lt.s32.totalorder (!%p653_p2), %s1971_s22, 1  ;;  %s2274_s28 = sld [smem:[#allocation11_spill]] (!%p653_p2) }
  0x12   : > { %656 = sbr.rel (%p653_p2) target bundleno = 2362 (0x93a), region = 100  ;;  %s2275_s6 = sld [smem:[#allocation12_spill]] (!%p653_p2) }
  0x13   : > { %p1703_p4 = scmp.ne.s32.totalorder (!%p653_p2), %s1971_s22, 0 }
  0x17   : > { %s1977_s23 = scalar_select %p744_p3, %s1971_s22, 1 }
  0x18   : > { %s2276_s1 = sld [smem:[#allocation7_spill]] (!%p1703_p4) }
  0x19   : > { %s1731_s24 = sshll.u32 %s1977_s23, 5  ;;  %s1734_s16 = sshll.u32 %s1977_s23, 7 }
  0x1a   : > { %s1987_s4 = scalar_lea.vmem %s2274_s28, %s1731_s24  ;;  %s1992_s0 = scalar_lea.vmem %s2275_s6, %s1731_s24 }
  0x1b   : > { %s2009_s28 = scalar_lea.vmem %s2247_s10, %s1731_s24  ;;  %s773_s6 = scalar_lea.vmem %s2248_s11, %s1977_s23 }
  0x1c   : > { %s2019_s20 = scalar_lea.vmem %s2249_s12, %s1734_s16  ;;  %s781_s2 = scalar_lea.vmem %s2250_s13, %s1977_s23 }
  0x1d   : > { %s784_s26 = scalar_lea.vmem %s2251_s14, %s1977_s23  ;;  %s787_s18 = scalar_lea.vmem %s2252_s15, %s1977_s23 }
  0x1e   : > { %791 = sbr.rel (%p1703_p4) target bundleno = 313 (0x139), region = 104  ;;  %s2277_s21 = smov (!%p1703_p4), %s2276_s1 }
  0x1f   : > { %s2278_s25 = sld [smem:[#allocation9_spill]] (!%p1703_p4) }
  0x20   : > { %s2279_s29 = sld [smem:[#allocation10_spill]] (!%p1703_p4) }
  0x23   : > { %v792_v0 = vld [vmem:[%s2276_s1] sm:$0xff]  ;;  %vm796_vm0 = vcmask 261120   ;;  %v793_v2 = vld [vmem:[%s2277_s21 + $0x8] sm:$0xff]  ;;  %v1852_v4 = vmov 32.0  }
  0x24   : > { %v797_v1 = vsel %vm796_vm0, %v792_v0, 0.0  ;;  %v800_v3 = vsel %vm796_vm0, %v793_v2, 0.0  ;;  %1759 = vrcp.f32 %v1852_v4 }
  0x25   : > { %798 = vadd.xlane.f32.xlu0 %v797_v1  ;;  %v1757_v35 = vld [vmem:[%s2278_s25] ss:$0 sm:$0xff] }
  0x26   : > { %v1758_v38 = vld [vmem:[%s2279_s29] ss:$0 sm:$0xff] }
  0x2a   : > { %v1760_v5 = vpop.eup %1759 }
  0x2b   : > { %v804_v6 = vmul.f32 32.0, %v1760_v5  ;;  %vm808_vm1 = vweird.f32 %v1760_v5 }
  0x2d   : > { %801 = vadd.xlane.f32.xlu0 %v800_v3  ;;  %v805_v7 = vsub.f32 1.0, %v804_v6 }
  0x2f   : > { %v806_v8 = vmul.f32 %v1760_v5, %v805_v7 }
  0x31   : > { %v807_v9 = vadd.f32 %v1760_v5, %v806_v8 }
  0x33   : > { %v809_v10 = vsel %vm808_vm1, %v1760_v5, %v807_v9 }
  0x98   : > { %v799_v11 = vpop.xlane.xlu0 %798 }
  0x99   : > { %v810_v12 = vmul.f32 %v809_v10, %v799_v11 }
  0x9b   : > { %v812_v13 = vsub.f32 %v792_v0, %v810_v12 }
  0x9d   : > { %v814_v14 = vmul.f32 %v812_v13, %v812_v13 }
  0x9f   : > { %v816_v15 = vsel %vm796_vm0, %v814_v14, 0.0 }
  0xa0   : > { %817 = vadd.xlane.f32.xlu1 %v816_v15  ;;  %v802_v16 = vpop.xlane.xlu0 %801 }
  0xa1   : > { %v811_v17 = vmul.f32 %v809_v10, %v802_v16 }
  0xa3   : > { %v813_v18 = vsub.f32 %v793_v2, %v811_v17 }
  0xa5   : > { %v815_v19 = vmul.f32 %v813_v18, %v813_v18 }
  0xa7   : > { %v819_v20 = vsel %vm796_vm0, %v815_v19, 0.0 }
  0xa8   : > { %820 = vadd.xlane.f32.xlu1 %v819_v20 }
 0x113   : > { %v818_v21 = vpop.xlane.xlu1 %817 }
 0x114   : > { %v822_v22 = vmul.f32 %v818_v21, %v809_v10 }
 0x116   : > { %v824_v23 = vadd.f32 1e-12, %v822_v22 }
 0x118   : > { %1761 = vrsqrt.f32 %v824_v23  ;;  %vm832_vm3 = vweird.f32 %v824_v23 }
 0x11b   : > { %v821_v24 = vpop.xlane.xlu1 %820 }
 0x11c   : > { %v823_v25 = vmul.f32 %v821_v24, %v809_v10 }
 0x11e   : > { %v1762_v26 = vpop.eup %1761  ;;  %v825_v27 = vadd.f32 1e-12, %v823_v25 }
 0x11f   : > { %v827_v28 = vmul.f32 %v1762_v26, %v824_v23  ;;  %vm833_vm2 = vweird.f32 %v1762_v26 }
 0x120   : > { %1763 = vrsqrt.f32 %v825_v27  ;;  %vm834_vm4 = vmor %vm832_vm3, %vm833_vm2  ;;  %vm842_vm6 = vweird.f32 %v825_v27 }
 0x121   : > { %v828_v29 = vmul.f32 %v1762_v26, %v827_v28 }
 0x123   : > { %v829_v30 = vmul.f32 0.5, %v828_v29 }
 0x125   : > { %v830_v31 = vsub.f32 1.5, %v829_v30 }
 0x126   : > { %v1764_v32 = vpop.eup %1763 }
 0x127   : > { %v831_v33 = vmul.f32 %v1762_v26, %v830_v31  ;;  %v837_v34 = vmul.f32 %v1764_v32, %v825_v27  ;;  %vm843_vm5 = vweird.f32 %v1764_v32 }
 0x128   : > { %vm844_vm7 = vmor %vm842_vm6, %vm843_vm5 }
 0x129   : > { %v835_v36 = vsel %vm834_vm4, %v1762_v26, %v831_v33  ;;  %v838_v37 = vmul.f32 %v1764_v32, %v837_v34 }
 0x12a   : > { %v846_v39 = vmul.f32 %v835_v36, %v812_v13 }
 0x12b   : > { %v839_v40 = vmul.f32 0.5, %v838_v37 }
 0x12c   : > { %v851_v41 = vmul.f32 %v1757_v35, %v846_v39 }
 0x12d   : > { %v840_v42 = vsub.f32 1.5, %v839_v40 }
 0x12e   : > { %v856_v43 = vadd.f32 %v1758_v38, %v851_v41 }
 0x12f   : > { %v841_v44 = vmul.f32 %v1764_v32, %v840_v42 }
 0x130   : > { %858 = vst.msk [vmem:[#allocation2] sm:$0xff] %vm796_vm0, %v856_v43 }
 0x131   : > { %v845_v45 = vsel %vm844_vm7, %v1764_v32, %v841_v44 }
 0x132   : > { %v847_v46 = vmul.f32 %v845_v45, %v813_v18 }
 0x134   : > { %v852_v47 = vmul.f32 %v1757_v35, %v847_v46 }
 0x136   : > { %v857_v48 = vadd.f32 %v1758_v38, %v852_v47 }
 0x138   : > { %859 = vst.msk [vmem:[#allocation2 + $0x8] sm:$0xff] %vm796_vm0, %v857_v48 }
 0x139 PF: > { %v865_v49 = vld [vmem:[%s1987_s4 + $0x18] sm:$0xff]  ;;  %v864_v50 = vld [vmem:[%s1987_s4 + $0x10] sm:$0xff]  ;;  %v863_v51 = vld [vmem:[%s1987_s4 + $0x8] sm:$0xff]  ;;  %vm870_vm8 = vcmask 261120   ;;  %s2280_s16 = scalar_lea.vmem %s2242_s5, %s1977_s23  ;;  %s1854_s17 = smov 96   ;;  %vm912_vm9 = vcmask 130048  }
 0x13a   : > { %889 = vmatpush.msra.mxu0 %v865_v49  ;;  %v862_v52 = vld [vmem:[%s1987_s4] sm:$0xff]  ;;  %s1853_s4 = smov 80   ;;  %s1855_s3 = smov 112   ;;  %vm966_vm10 = vcmask 64512   ;;  %v1042_v45 = vld [vmem:[%s1992_s0 + $0x8] sm:$0xff] }
 0x13b   : > { %v2056_v53 = vld [vmem:[#allocation2] sm:$0xff]  ;;  %s2281_s24 = sld [smem:[#allocation8_spill]]  ;;  %s1856_s27 = smov 64  }
 0x13c   : > { %890 = vmatpush.msra.mxu0 %v864_v50  ;;  %v1770_v55 = vld [vmem:[%s2280_s16] ss:$0 sm:$0xff]  ;;  %s1857_s29 = smov 48   ;;  %s2282_s16 = scalar_lea.vmem %s2244_s7, %s1977_s23 }
 0x13d   : > { %s2284_s19 = scalar_lea.vmem %s2246_s9, %s1977_s23  ;;  %p1724_p5 = scmp.ne.s32.totalorder %s1971_s22, 1 }
 0x13e   : > { %891 = vmatpush.msra.mxu0 %v863_v51  ;;  %s2286_s25 = sld [smem:[#allocation15_spill]] (!%p1724_p5) }
 0x13f   : > { %v2060_v54 = vld [vmem:[#allocation2 + $0x8] sm:$0xff] }
 0x140   : > { %892 = vmatpush.msra.mxu0 %v862_v52 }
 0x141   : > { %1704 = vmatmul.msk.f32.vlgmr.msra.gmra.mxu0 %vm870_vm8, %v2056_v53  ;;  %v902_v4 = vld [vmem:[%s2281_s24] sm:$0x3] }
 0x142   : > { %v905_v5 = vperm.slane %v902_v4, 0  ;;  %v904_v10 = vrot.slane %v902_v4, 1 }
 0x144   : > { %v906_v13 = vperm.slane %v904_v10, 0 }
 0x149   : > { %1705 = vmatmul.msk.f32.gmra.mxu0 %vm870_vm8, %v2060_v54 }
 0x1be   : > { %v894_v56 = vpop.f32.mrf.mxu0 }
 0x1bf   : > { %v2069_v57 = vadd.f32 %v1770_v55, %v894_v56 }
 0x1c1   : > { %1045 = vrot.lane.b32.xlu1 %v2069_v57, %s1853_s4  ;;  %910 = vrot.lane.b32.xlu0 %v2069_v57, %s1854_s17  ;;  %v900_v60 = vmul.f32 0.25, %v2069_v57 }
 0x1c6   : > { %v897_v58 = vpop.f32.mrf.mxu0 }
 0x1c7   : > { %v2073_v59 = vadd.f32 %v1770_v55, %v897_v58 }
 0x1c9   : > { %1073 = vrot.lane.b32.xlu2 %v2073_v59, %s1853_s4  ;;  %939 = vrot.lane.b32.xlu0 %v2073_v59, %s1854_s17  ;;  %v901_v61 = vmul.f32 0.25, %v2073_v59  ;;  %v1765_v20 = vpack.i.bf16 %v2073_v59, %v2069_v57  ;;  %s2283_s4 = scalar_lea.vmem %s2245_s8, %s1977_s23  ;;  %s2287_s23 = sld [smem:[#allocation14_spill]] (!%p1724_p5) }
 0x1ca   : > { %1043 = vrot.lane.b32.xlu1 %v900_v60, %s1855_s3 }
 0x1d1   : > { %1071 = vrot.lane.b32.xlu2 %v901_v61, %s1855_s3 }
 0x223   : > { %v1074_v1 = vpop.permute.xlu2 %1073 }
 0x22b   : > { %v1072_v3 = vpop.permute.xlu2 %1071 }
 0x233   : > { %v1046_v62 = vpop.permute.xlu1 %1045  ;;  %v911_v63 = vpop.permute.xlu0 %910 }
 0x234   : > { %1706 = vmatpush.xpose.msk.msra.mxu2 %vm912_vm9, %v911_v63  ;;  %1712 = vmatpush.xpose.msk.msrb.mxu0 %vm912_vm9, %v1046_v62  ;;  %v1174_v62 = vld [vmem:[%s1992_s0 + $0x18] sm:$0xff]  ;;  %v1173_v63 = vld [vmem:[%s1992_s0 + $0x10] sm:$0xff] }
 0x237   : > { %1707 = vmatmul.msk.f32.vlgmr.msra.gmra.mxu2 %vm912_vm9, %v900_v60 }
 0x238   : > { %1224 = vmatpush.msra.mxu0 %v1042_v45 }
 0x23b   : > { %v940_v0 = vpop.permute.xlu0 %939 }
 0x23c   : > { %v1044_v2 = vpop.permute.xlu1 %1043  ;;  %1708 = vmatpush.xpose.msk.msrb.mxu2 %vm912_vm9, %v940_v0 }
 0x23d   : > { %1713 = vmatmul.msk.f32.vlgmr.msrb.gmra.mxu0 %vm912_vm9, %v1044_v2 }
 0x23f   : > { %1709 = vmatmul.msk.f32.vlgmr.msrb.gmra.mxu2 %vm912_vm9, %v901_v61  ;;  %v1041_v61 = vld [vmem:[%s1992_s0] sm:$0xff]  ;;  %s2288_s0 = sld [smem:[#allocation16_spill]] (!%p1724_p5) }
 0x240   : > { %1714 = vmatpush.xpose.msk.msra.mxu2 %vm912_vm9, %v1074_v1  ;;  %1225 = vmatpush.msra.mxu0 %v1041_v61 }
 0x244   : > { %1195 = vmatpush.msrb.mxu2 %v1174_v62 }
 0x246   : > { %1196 = vmatpush.msrb.mxu2 %v1173_v63 }
 0x247   : > { %1715 = vmatmul.msk.f32.vlgmr.msra.gmra.mxu2 %vm912_vm9, %v1072_v3 }
 0x2ba   : > { %v1068_v6 = vpop.f32.mrf.mxu0  ;;  %v935_v7 = vpop.f32.mrf.mxu2 }
 0x2bb   : > { %v1069_v8 = vadd.f32 %v1068_v6, %v905_v5  ;;  %v936_v9 = vadd.f32 %v935_v7, %v905_v5  ;;  %v1771_v5 = vld [vmem:[%s2282_s16] ss:$0 sm:$0xff] }
 0x2bd   : > { %v1099_v11 = vsel %vm966_vm10, %v1069_v8, -inf  ;;  %v967_v12 = vsel %vm966_vm10, %v936_v9, -inf }
 0x2be   : > { %1100 = vmax.xlane.f32.xlu2 %v1099_v11  ;;  %968 = vmax.xlane.f32.xlu0 %v967_v12 }
 0x2c2   : > { %v963_v14 = vpop.f32.mrf.mxu2 }
 0x2c3   : > { %v964_v15 = vadd.f32 %v963_v14, %v906_v13 }
 0x2c5   : > { %v970_v16 = vsel %vm966_vm10, %v964_v15, -inf }
 0x2c6   : > { %971 = vmax.xlane.f32.xlu1 %v970_v16 }
 0x2ca   : > { %v1096_v17 = vpop.f32.mrf.mxu2 }
 0x2cb   : > { %v1097_v18 = vadd.f32 %v1096_v17, %v906_v13  ;;  %v1858_v17 = vmov 32.0  }
 0x2cd   : > { %v1102_v19 = vsel %vm966_vm10, %v1097_v18, -inf }
 0x2ce   : > { %1103 = vmax.xlane.f32.xlu2 %v1102_v19 }
 0x2e6   : > { %1766 = vrot.lane.b32.xlu2 %v1765_v20, %s1856_s27 }
 0x331   : > { %v1101_v21 = vpop.xlane.xlu2 %1100  ;;  %v969_v22 = vpop.xlane.xlu0 %968 }
 0x332   : > { %v1105_v23 = vsub.f32 %v1069_v8, %v1101_v21  ;;  %v973_v25 = vsub.f32 %v936_v9, %v969_v22 }
 0x334   : > { %v1107_v24 = vmul.f32 1.442695, %v1105_v23  ;;  %v975_v26 = vmul.f32 1.442695, %v973_v25 }
 0x336   : > { %1778 = vpow2.f32 %v1107_v24 }
 0x337   : > { %1780 = vpow2.f32 %v975_v26 }
 0x339   : > { %v972_v27 = vpop.xlane.xlu1 %971 }
 0x33a   : > { %v974_v28 = vsub.f32 %v964_v15, %v972_v27 }
 0x33c   : > { %v1779_v29 = vpop.eup %1778  ;;  %v977_v30 = vmul.f32 1.442695, %v974_v28 }
 0x33d   : > { %v1111_v31 = vsel %vm966_vm10, %v1779_v29, 0.0  ;;  %v1781_v33 = vpop.eup %1780 }
 0x33e   : > { %1782 = vpow2.f32 %v977_v30  ;;  %1112 = vadd.xlane.f32.xlu0 %v1111_v31  ;;  %v979_v37 = vsel %vm966_vm10, %v1781_v33, 0.0 }
 0x341   : > { %v1104_v32 = vpop.xlane.xlu2 %1103 }
 0x342   : > { %v1106_v34 = vsub.f32 %v1097_v18, %v1104_v32  ;;  %v1307_v32 = vld [vmem:[%s2009_s28 + $0x18] sm:$0xff] }
 0x344   : > { %v1783_v35 = vpop.eup %1782  ;;  %v1109_v36 = vmul.f32 1.442695, %v1106_v34  ;;  %v1305_v34 = vld [vmem:[%s2009_s28 + $0x8] sm:$0xff] }
 0x345   : > { %v982_v38 = vsel %vm966_vm10, %v1783_v35, 0.0 }
 0x346   : > { %1784 = vpow2.f32 %v1109_v36  ;;  %980 = vadd.xlane.f32.xlu0 %v979_v37  ;;  %983 = vadd.xlane.f32.xlu1 %v982_v38 }
 0x349   : > { %v1767_v39 = vpop.permute.xlu2 %1766 }
 0x34a   : > { %v1768_v40 = vunpack.i.l.bf16 %v1767_v39  ;;  %v1769_v41 = vunpack.i.h.bf16 %v1767_v39  ;;  %v1374_v39 = vld [vmem:[%s2019_s20 + $0x78] sm:$0xff] }
 0x34c   : > { %v1785_v42 = vpop.eup %1784  ;;  %1010 = vmatpush.msra.mxu3 %v1768_v40  ;;  %v1373_v40 = vld [vmem:[%s2019_s20 + $0x70] sm:$0xff] }
 0x34d   : > { %v1114_v43 = vsel %vm966_vm10, %v1785_v42, 0.0 }
 0x34e   : > { %1036 = vmatpush.msrb.mxu3 %v1769_v41  ;;  %1115 = vadd.xlane.f32.xlu0 %v1114_v43  ;;  %v1372_v41 = vld [vmem:[%s2019_s20 + $0x68] sm:$0xff] }
 0x35f   : > { %1121 = vrot.lane.b32.xlu1 %v2069_v57, %s1857_s29 }
 0x362   : > { %1147 = vrot.lane.b32.xlu0 %v2073_v59, %s1857_s29 }
 0x3b1   : > { %v1113_v44 = vpop.xlane.xlu0 %1112 }
 0x3b9   : > { %v981_v46 = vpop.xlane.xlu0 %980  ;;  %v984_v47 = vpop.xlane.xlu1 %983 }
 0x3ba   : > { %1786 = vrcp.f32 %v981_v46 }
 0x3bb   : > { %1788 = vrcp.f32 %v984_v47 }
 0x3bc   : > { %1790 = vrcp.f32 %v1113_v44  ;;  %v1371_v44 = vld [vmem:[%s2019_s20 + $0x60] sm:$0xff] }
 0x3c0   : > { %v1787_v48 = vpop.eup %1786 }
 0x3c1   : > { %v987_v49 = vmul.f32 %v1787_v48, %v1781_v33  ;;  %v1789_v50 = vpop.eup %1788  ;;  %v1116_v51 = vpop.xlane.xlu0 %1115  ;;  %v1306_v33 = vld [vmem:[%s2009_s28 + $0x10] sm:$0xff] }
 0x3c2   : > { %v988_v52 = vmul.f32 %v1789_v50, %v1783_v35  ;;  %1792 = vrcp.f32 %v1116_v51  ;;  %v1791_v55 = vpop.eup %1790  ;;  %v1304_v35 = vld [vmem:[%s2009_s28] sm:$0xff] }
 0x3c3   : > { %1710 = vmatmul.msk.f32.vlgmr.msra.gmra.mxu3 %vm966_vm10, %v987_v49  ;;  %v1119_v57 = vmul.f32 %v1791_v55, %v1779_v29  ;;  %1794 = vrcp.f32 %v1858_v17  ;;  %v1359_v17 = vld [vmem:[%s2019_s20] sm:$0xff] }
 0x3c8   : > { %v1793_v56 = vpop.eup %1792 }
 0x3c9   : > { %v1120_v60 = vmul.f32 %v1793_v56, %v1785_v42  ;;  %v1795_v18 = vpop.eup %1794  ;;  %v1772_v56 = vld [vmem:[%s2283_s4] ss:$0 sm:$0xff] }
 0x3ca   : > { %v1250_v19 = vmul.f32 32.0, %v1795_v18  ;;  %vm1254_vm11 = vweird.f32 %v1795_v18 }
 0x3cb   : > { %1711 = vmatmul.msk.f32.vlgmr.msrb.gmra.mxu3 %vm966_vm10, %v988_v52 }
 0x3cc   : > { %v1251_v20 = vsub.f32 1.0, %v1250_v19 }
 0x3ce   : > { %v1252_v21 = vmul.f32 %v1795_v18, %v1251_v20 }
 0x3d1   : > { %v1122_v58 = vpop.permute.xlu1 %1121 }
 0x3d2   : > { %1142 = vmatpush.msra.mxu3 %v1122_v58 }
 0x3d3   : > { %1716 = vmatmul.msk.f32.vlgmr.msra.gmra.mxu3 %vm966_vm10, %v1119_v57 }
 0x3d4   : > { %v1148_v59 = vpop.permute.xlu0 %1147  ;;  %1330 = vmatpush.msrb.mxu3 %v1307_v32 }
 0x3d5   : > { %1168 = vmatpush.msra.mxu1 %v1148_v59 }
 0x3d6   : > { %1717 = vmatmul.msk.f32.vlgmr.msra.gmra.mxu1 %vm966_vm10, %v1120_v60  ;;  %1331 = vmatpush.msrb.mxu3 %v1306_v33  ;;  %v1773_v60 = vld [vmem:[%s2284_s19] ss:$0 sm:$0xff] }
 0x3d7   : > { %1379 = vmatpush.msrb.mxu1 %v1374_v39 }
 0x3d8   : > { %1332 = vmatpush.msrb.mxu3 %v1305_v34 }
 0x3d9   : > { %1380 = vmatpush.msrb.mxu1 %v1373_v40  ;;  %v1775_v40 = vld [vmem:[%s781_s2] ss:$0 sm:$0xff] }
 0x3da   : > { %1333 = vmatpush.msrb.mxu3 %v1304_v35 }
 0x3db   : > { %1381 = vmatpush.msrb.mxu1 %v1372_v41 }
 0x3dd   : > { %1382 = vmatpush.msrb.mxu1 %v1371_v44 }
 0x446   : > { %v1012_v0 = vpop.f32.mrf.mxu3 }
 0x447   : > { %1720 = vmatmul.msk.f32.vlgmr.msra.gmra.mxu0 %vm912_vm9, %v1012_v0 }
 0x44e   : > { %v1038_v1 = vpop.f32.mrf.mxu3 }
 0x44f   : > { %1721 = vmatmul.msk.f32.gmra.mxu0 %vm912_vm9, %v1038_v1 }
 0x453   : > { %v1170_v3 = vpop.f32.mrf.mxu1 }
 0x456   : > { %v1144_v2 = vpop.f32.mrf.mxu3 }
 0x457   : > { %1718 = vmatmul.msk.f32.vlgmr.msrb.gmra.mxu2 %vm912_vm9, %v1144_v2 }
 0x45f   : > { %1719 = vmatmul.msk.f32.gmra.mxu2 %vm912_vm9, %v1170_v3 }
 0x4c4   : > { %v1227_v4 = vpop.f32.mrf.mxu0 }
 0x4cc   : > { %v1230_v11 = vpop.f32.mrf.mxu0 }
 0x4da   : > { %v1198_v6 = vpop.f32.mrf.mxu2 }
 0x4db   : > { %v1228_v7 = vadd.f32 %v1227_v4, %v1198_v6  ;;  %v1370_v6 = vld [vmem:[%s2019_s20 + $0x58] sm:$0xff] }
 0x4dc   : > { %1383 = vmatpush.msrb.mxu1 %v1370_v6 }
 0x4dd   : > { %v1237_v8 = vadd.f32 %v1771_v5, %v1228_v7  ;;  %v1369_v7 = vld [vmem:[%s2019_s20 + $0x50] sm:$0xff] }
 0x4de   : > { %1384 = vmatpush.msrb.mxu1 %v1369_v7 }
 0x4df   : > { %v1239_v9 = vadd.f32 %v1237_v8, %v2056_v53  ;;  %v1253_v53 = vadd.f32 %v1795_v18, %v1252_v21  ;;  %v1368_v8 = vld [vmem:[%s2019_s20 + $0x48] sm:$0xff] }
 0x4e0   : > { %1385 = vmatpush.msrb.mxu1 %v1368_v8 }
 0x4e1   : > { %v1243_v10 = vsel %vm870_vm8, %v1239_v9, 0.0  ;;  %v2123_v22 = vsel %vm1254_vm11, %v1795_v18, %v1253_v53  ;;  %v1774_v18 = vld [vmem:[%s773_s6] ss:$0 sm:$0xff] }
 0x4e2   : > { %1244 = vadd.xlane.f32.xlu2 %v1243_v10  ;;  %v1201_v12 = vpop.f32.mrf.mxu2  ;;  %v1366_v10 = vld [vmem:[%s2019_s20 + $0x38] sm:$0xff] }
 0x4e3   : > { %v1231_v13 = vadd.f32 %v1230_v11, %v1201_v12  ;;  %v1365_v11 = vld [vmem:[%s2019_s20 + $0x30] sm:$0xff]  ;;  %v1364_v12 = vld [vmem:[%s2019_s20 + $0x28] sm:$0xff] }
 0x4e5   : > { %v1238_v14 = vadd.f32 %v1771_v5, %v1231_v13  ;;  %v1363_v13 = vld [vmem:[%s2019_s20 + $0x20] sm:$0xff] }
 0x4e7   : > { %v1240_v15 = vadd.f32 %v1238_v14, %v2060_v54  ;;  %v1362_v14 = vld [vmem:[%s2019_s20 + $0x18] sm:$0xff] }
 0x4e9   : > { %v1246_v16 = vsel %vm870_vm8, %v1240_v15, 0.0 }
 0x4ea   : > { %1247 = vadd.xlane.f32.xlu1 %v1246_v16  ;;  %v1360_v16 = vld [vmem:[%s2019_s20 + $0x8] sm:$0xff] }
 0x555   : > { %v1245_v23 = vpop.xlane.xlu2 %1244 }
 0x556   : > { %v1256_v24 = vmul.f32 %v2123_v22, %v1245_v23 }
 0x558   : > { %v1258_v54 = vsub.f32 %v1239_v9, %v1256_v24  ;;  %v1367_v9 = vld [vmem:[%s2019_s20 + $0x40] sm:$0xff] }
 0x559   : > { %1386 = vmatpush.msrb.mxu1 %v1367_v9 }
 0x55a   : > { %v1260_v25 = vmul.f32 %v1258_v54, %v1258_v54 }
 0x55b   : > { %1387 = vmatpush.msrb.mxu1 %v1366_v10 }
 0x55c   : > { %v1262_v26 = vsel %vm870_vm8, %v1260_v25, 0.0 }
 0x55d   : > { %1263 = vadd.xlane.f32.xlu0 %v1262_v26  ;;  %v1248_v27 = vpop.xlane.xlu1 %1247  ;;  %1388 = vmatpush.msrb.mxu1 %v1365_v11  ;;  %v1776_v11 = vld [vmem:[%s784_s26] ss:$0 sm:$0xff]  ;;  %s2285_s26 = sld [smem:[#allocation13_spill]] (!%p1724_p5) }
 0x55e   : > { %v1257_v28 = vmul.f32 %v2123_v22, %v1248_v27 }
 0x55f   : > { %1389 = vmatpush.msrb.mxu1 %v1364_v12 }
 0x560   : > { %v1259_v29 = vsub.f32 %v1240_v15, %v1257_v28  ;;  %v1361_v15 = vld [vmem:[%s2019_s20 + $0x10] sm:$0xff] }
 0x561   : > { %1390 = vmatpush.msrb.mxu1 %v1363_v13  ;;  %v1777_v13 = vld [vmem:[%s787_s18] ss:$0 sm:$0xff] }
 0x562   : > { %v1261_v30 = vmul.f32 %v1259_v29, %v1259_v29 }
 0x563   : > { %1391 = vmatpush.msrb.mxu1 %v1362_v14 }
 0x564   : > { %v1265_v31 = vsel %vm870_vm8, %v1261_v30, 0.0 }
 0x565   : > { %1266 = vadd.xlane.f32.xlu2 %v1265_v31  ;;  %1392 = vmatpush.msrb.mxu1 %v1361_v15 }
 0x567   : > { %1393 = vmatpush.msrb.mxu1 %v1360_v16 }
 0x569   : > { %1394 = vmatpush.msrb.mxu1 %v1359_v17 }
 0x5d0   : > { %v1264_v36 = vpop.xlane.xlu0 %1263 }
 0x5d1   : > { %v1268_v37 = vmul.f32 %v1264_v36, %v2123_v22 }
 0x5d3   : > { %v1270_v38 = vadd.f32 1e-12, %v1268_v37 }
 0x5d5   : > { %1796 = vrsqrt.f32 %v1270_v38  ;;  %vm1278_vm13 = vweird.f32 %v1270_v38 }
 0x5d8   : > { %v1267_v42 = vpop.xlane.xlu2 %1266 }
 0x5d9   : > { %v1269_v43 = vmul.f32 %v1267_v42, %v2123_v22 }
 0x5db   : > { %v1797_v45 = vpop.eup %1796  ;;  %v1271_v46 = vadd.f32 1e-12, %v1269_v43 }
 0x5dc   : > { %v1273_v47 = vmul.f32 %v1797_v45, %v1270_v38  ;;  %vm1279_vm12 = vweird.f32 %v1797_v45 }
 0x5dd   : > { %1798 = vrsqrt.f32 %v1271_v46  ;;  %vm1280_vm14 = vmor %vm1278_vm13, %vm1279_vm12  ;;  %vm1288_vm0 = vweird.f32 %v1271_v46 }
 0x5de   : > { %v1274_v48 = vmul.f32 %v1797_v45, %v1273_v47 }
 0x5e0   : > { %v1275_v49 = vmul.f32 0.5, %v1274_v48 }
 0x5e2   : > { %v1276_v50 = vsub.f32 1.5, %v1275_v49 }
 0x5e3   : > { %v1799_v51 = vpop.eup %1798 }
 0x5e4   : > { %v1277_v52 = vmul.f32 %v1797_v45, %v1276_v50  ;;  %v1283_v55 = vmul.f32 %v1799_v51, %v1271_v46  ;;  %vm1289_vm15 = vweird.f32 %v1799_v51 }
 0x5e5   : > { %vm1290_vm1 = vmor %vm1288_vm0, %vm1289_vm15 }
 0x5e6   : > { %v1281_v57 = vsel %vm1280_vm14, %v1797_v45, %v1277_v52  ;;  %v1284_v58 = vmul.f32 %v1799_v51, %v1283_v55 }
 0x5e7   : > { %v1292_v59 = vmul.f32 %v1281_v57, %v1258_v54 }
 0x5e8   : > { %v1285_v61 = vmul.f32 0.5, %v1284_v58 }
 0x5e9   : > { %v1297_v62 = vmul.f32 %v1772_v56, %v1292_v59 }
 0x5ea   : > { %v1286_v63 = vsub.f32 1.5, %v1285_v61 }
 0x5eb   : > { %v2149_v0 = vadd.f32 %v1773_v60, %v1297_v62 }
 0x5ec   : > { %v1287_v1 = vmul.f32 %v1799_v51, %v1286_v63 }
 0x5ed   : > { %1722 = vmatmul.msk.f32.vlgmr.msrb.gmra.mxu3 %vm870_vm8, %v2149_v0 }
 0x5ee   : > { %v1291_v2 = vsel %vm1290_vm1, %v1799_v51, %v1287_v1 }
 0x5ef   : > { %v1293_v3 = vmul.f32 %v1291_v2, %v1259_v29 }
 0x5f1   : > { %v1298_v4 = vmul.f32 %v1772_v56, %v1293_v3 }
 0x5f3   : > { %v1303_v5 = vadd.f32 %v1773_v60, %v1298_v4 }
 0x5f5   : > { %1723 = vmatmul.msk.f32.gmra.mxu3 %vm870_vm8, %v1303_v5 }
 0x670   : > { %v1335_v19 = vpop.f32.mrf.mxu3 }
 0x671   : > { %v1336_v20 = vadd.f32 %v1774_v18, %v1335_v19 }
 0x673   : > { %v1343_v21 = vmul.f32 0.044715, %v1336_v20  ;;  %v1341_v33 = vmul.f32 0.5, %v1336_v20 }
 0x675   : > { %v1345_v53 = vmul.f32 %v1343_v21, %v1336_v20 }
 0x677   : > { %v1347_v23 = vmul.f32 %v1345_v53, %v1336_v20 }
 0x678   : > { %v1338_v24 = vpop.f32.mrf.mxu3 }
 0x679   : > { %v1339_v54 = vadd.f32 %v1774_v18, %v1338_v24  ;;  %v1349_v25 = vadd.f32 %v1347_v23, %v1336_v20 }
 0x67b   : > { %v1351_v26 = vmul.f32 0.7978846, %v1349_v25  ;;  %v1344_v27 = vmul.f32 0.044715, %v1339_v54  ;;  %v1342_v37 = vmul.f32 0.5, %v1339_v54 }
 0x67d   : > { %1800 = vtanh.f32 %v1351_v26  ;;  %v1346_v28 = vmul.f32 %v1344_v27, %v1339_v54 }
 0x67f   : > { %v1348_v29 = vmul.f32 %v1346_v28, %v1339_v54 }
 0x681   : > { %v1350_v30 = vadd.f32 %v1348_v29, %v1339_v54 }
 0x683   : > { %v1801_v31 = vpop.eup %1800  ;;  %v1352_v32 = vmul.f32 0.7978846, %v1350_v30 }
 0x684   : > { %v1355_v34 = vadd.f32 1.0, %v1801_v31 }
 0x685   : > { %1802 = vtanh.f32 %v1352_v32 }
 0x686   : > { %v1357_v35 = vmul.f32 %v1355_v34, %v1341_v33 }
 0x688   : > { %1395 = vmatmul.f32.vlgmr.msrb.gmra.mxu1 %v1357_v35 }
 0x68b   : > { %v1803_v36 = vpop.eup %1802 }
 0x68c   : > { %v1356_v38 = vadd.f32 1.0, %v1803_v36 }
 0x68e   : > { %v1358_v39 = vmul.f32 %v1356_v38, %v1342_v37 }
 0x690   : > { %1398 = vmatmul.f32.gmra.mxu1 %v1358_v39 }
 0x705   : > { %v1396_v41 = vpop.f32.mrf.mxu1 }
 0x706   : > { %v1397_v42 = vadd.f32 %v1775_v40, %v1396_v41 }
 0x708   : > { %v1402_v43 = vadd.f32 %v1397_v42, %v2149_v0 }
 0x70a   : > { %v1406_v44 = vsel %vm870_vm8, %v1402_v43, 0.0 }
 0x70b   : > { %1407 = vadd.xlane.f32.xlu1 %v1406_v44 }
 0x70d   : > { %v1399_v45 = vpop.f32.mrf.mxu1 }
 0x70e   : > { %v1400_v46 = vadd.f32 %v1775_v40, %v1399_v45 }
 0x710   : > { %v1403_v47 = vadd.f32 %v1400_v46, %v1303_v5 }
 0x712   : > { %v1409_v48 = vsel %vm870_vm8, %v1403_v47, 0.0 }
 0x713   : > { %1410 = vadd.xlane.f32.xlu2 %v1409_v48 }
 0x77e   : > { %v1408_v49 = vpop.xlane.xlu1 %1407 }
 0x77f   : > { %v1412_v50 = vmul.f32 %v1408_v49, %v2123_v22 }
 0x781   : > { %v1414_v51 = vsub.f32 %v1402_v43, %v1412_v50 }
 0x783   : > { %v1416_v52 = vmul.f32 %v1414_v51, %v1414_v51 }
 0x785   : > { %v1418_v55 = vsel %vm870_vm8, %v1416_v52, 0.0 }
 0x786   : > { %v1411_v56 = vpop.xlane.xlu2 %1410  ;;  %1419 = vadd.xlane.f32.xlu1 %v1418_v55 }
 0x787   : > { %v1413_v57 = vmul.f32 %v1411_v56, %v2123_v22 }
 0x789   : > { %v1415_v58 = vsub.f32 %v1403_v47, %v1413_v57 }
 0x78b   : > { %v1417_v59 = vmul.f32 %v1415_v58, %v1415_v58 }
 0x78d   : > { %v1421_v60 = vsel %vm870_vm8, %v1417_v59, 0.0 }
 0x78e   : > { %1422 = vadd.xlane.f32.xlu0 %v1421_v60 }
 0x7f9   : > { %v1420_v61 = vpop.xlane.xlu1 %1419 }
 0x7fa   : > { %v1424_v62 = vmul.f32 %v1420_v61, %v2123_v22 }
 0x7fc   : > { %v1426_v63 = vadd.f32 1e-12, %v1424_v62 }
 0x7fe   : > { %1804 = vrsqrt.f32 %v1426_v63  ;;  %vm1434_vm3 = vweird.f32 %v1426_v63 }
 0x801   : > { %v1423_v0 = vpop.xlane.xlu0 %1422 }
 0x802   : > { %v1425_v1 = vmul.f32 %v1423_v0, %v2123_v22 }
 0x804   : > { %v1805_v2 = vpop.eup %1804  ;;  %v1427_v3 = vadd.f32 1e-12, %v1425_v1 }
 0x805   : > { %v1429_v4 = vmul.f32 %v1805_v2, %v1426_v63  ;;  %vm1435_vm2 = vweird.f32 %v1805_v2 }
 0x806   : > { %1806 = vrsqrt.f32 %v1427_v3  ;;  %vm1436_vm4 = vmor %vm1434_vm3, %vm1435_vm2  ;;  %vm1444_vm6 = vweird.f32 %v1427_v3 }
 0x807   : > { %v1430_v5 = vmul.f32 %v1805_v2, %v1429_v4 }
 0x809   : > { %v1431_v6 = vmul.f32 0.5, %v1430_v5 }
 0x80b   : > { %v1432_v7 = vsub.f32 1.5, %v1431_v6 }
 0x80c   : > { %v1807_v8 = vpop.eup %1806 }
 0x80d   : > { %v1433_v9 = vmul.f32 %v1805_v2, %v1432_v7  ;;  %v1439_v10 = vmul.f32 %v1807_v8, %v1427_v3  ;;  %vm1445_vm5 = vweird.f32 %v1807_v8 }
 0x80e   : > { %vm1446_vm7 = vmor %vm1444_vm6, %vm1445_vm5 }
 0x80f   : > { %v1437_v22 = vsel %vm1436_vm4, %v1805_v2, %v1433_v9  ;;  %v1440_v12 = vmul.f32 %v1807_v8, %v1439_v10 }
 0x810   : > { %v1448_v14 = vmul.f32 %v1437_v22, %v1414_v51 }
 0x811   : > { %v1441_v15 = vmul.f32 0.5, %v1440_v12 }
 0x812   : > { %v1453_v16 = vmul.f32 %v1776_v11, %v1448_v14 }
 0x813   : > { %v1442_v17 = vsub.f32 1.5, %v1441_v15 }
 0x814   : > { %v1458_v18 = vadd.f32 %v1777_v13, %v1453_v16 }
 0x815   : > { %v1443_v19 = vmul.f32 %v1807_v8, %v1442_v17 }
 0x816   : > { %1460 = vst.msk [vmem:[#allocation2] sm:$0xff] %vm870_vm8, %v1458_v18 }
 0x817   : > { %v1447_v20 = vsel %vm1446_vm7, %v1807_v8, %v1443_v19 }
 0x818   : > { %v1449_v21 = vmul.f32 %v1447_v20, %v1415_v58 }
 0x81a   : > { %v1454_v53 = vmul.f32 %v1776_v11, %v1449_v21  ;;  %1465 = sbr.rel (%p1724_p5) target bundleno = 2351 (0x92f), region = 108 }
 0x81c   : > { %v1459_v23 = vadd.f32 %v1777_v13, %v1454_v53 }
 0x81e   : > { %1461 = vst.msk [vmem:[#allocation2 + $0x8] sm:$0xff] %vm870_vm8, %v1459_v23 }
 0x81f   : > { %v1469_v24 = vld [vmem:[%s2285_s26 + $0x18] sm:$0xff]  ;;  %v1468_v54 = vld [vmem:[%s2285_s26 + $0x10] sm:$0xff]  ;;  %v1476_v25 = vrot.slane %v1459_v23, 7  ;;  %v1467_v26 = vld [vmem:[%s2285_s26 + $0x8] sm:$0xff]  ;;  %vm1477_vm9 = vcmask 1041409   ;;  %vm1533_vm10 = vcmask 9216  }
 0x820   : > { %1493 = vmatpush.msra.mxu0 %v1469_v24  ;;  %v1466_v27 = vld [vmem:[%s2285_s26] sm:$0xff]  ;;  %v1505_v29 = vld [vmem:[%s2286_s25 + $0x18] sm:$0xff]  ;;  %v1504_v30 = vld [vmem:[%s2286_s25 + $0x10] sm:$0xff] }
 0x821   : > { %v1478_v28 = vsel %vm1477_vm9, %v1476_v25, %v1458_v18  ;;  %1525 = vmatpush.msra.mxu1 %v1505_v29  ;;  %v1503_v31 = vld [vmem:[%s2286_s25 + $0x8] sm:$0xff]  ;;  %v1502_v32 = vld [vmem:[%s2286_s25] sm:$0xff] }
 0x822   : > { %1494 = vmatpush.msra.mxu0 %v1468_v54  ;;  %v1808_v33 = vld [vmem:[%s2287_s23] ss:$0 sm:$0xff] }
 0x823   : > { %1526 = vmatpush.msra.mxu1 %v1504_v30  ;;  %v1809_v37 = vld [vmem:[%s2288_s0] ss:$0 sm:$0xff] }
 0x824   : > { %1495 = vmatpush.msra.mxu0 %v1467_v26 }
 0x825   : > { %1527 = vmatpush.msra.mxu1 %v1503_v31 }
 0x826   : > { %1496 = vmatpush.msra.mxu0 %v1466_v27 }
 0x827   : > { %1725 = vmatmul.msk.f32.vlgmr.msra.gmra.mxu0 %vm870_vm8, %v1478_v28  ;;  %1528 = vmatpush.msra.mxu1 %v1502_v32 }
 0x8a4   : > { %v1498_v34 = vpop.f32.mrf.mxu0 }
 0x8a5   : > { %v1499_v35 = vadd.f32 %v1808_v33, %v1498_v34 }
 0x8a7   : > { %1810 = vtanh.f32 %v1499_v35 }
 0x8ad   : > { %v1811_v36 = vpop.eup %1810 }
 0x8ae   : > { %1726 = vmatmul.msk.f32.vlgmr.msra.gmra.mxu1 %vm870_vm8, %v1811_v36 }
 0x92b   : > { %v1530_v38 = vpop.f32.mrf.mxu1 }
 0x92c   : > { %v1531_v39 = vadd.f32 %v1809_v37, %v1530_v38 }
 0x92e   : > { %1534 = vst.msk [vmem:[#allocation3] sm:$0x3] %vm1533_vm10, %v1531_v39 }
 0x92f PF: > { %p1739_p6 = scmp.eq.s32.totalorder %s1971_s22, 1  ;;  %s1859_s28 = smov [#allocation3]  }
 0x930   : > { %s1541_s4 = sshll.u32 %s1859_s28, 4  ;;  %s2289_s19 = sld [smem:[#allocation17_spill]]  ;;  %s1542_s4 = int_to_ptr.vmem [resolvable:$true] %s1541_s4 }
 0x936   : > { %s1543_s24 = sshll.u32 %s2289_s19, 4  ;;  %s1544_s24 = int_to_ptr.hbm [resolvable:$true] %s1543_s24 }
 0x937   : > { %1736 = dma.vmem_to_hbm [thread:$0]  (%p1739_p6), %s1542_s4, 32, %s1544_s24, [#allocation4]  }
 0x938   : > { %1845 = dma.done.wait (%p1739_p6), [#allocation4], 32  }
 0x939   : > { %1847 = vsyncadd (%p1739_p6), [#allocation4], 4294967264 }
 0x93a PF: > { %s2290_s6 = sld [smem:[#allocation6_spill]] }
 0x940   : > { %s31_s1 = sadd.s32 1, %s2290_s6  }
 0x941   : > { %p28_p7 = scmp.ge.s32.totalorder %s31_s1, 4  }
 0x943   :  { %30 = sbr.rel (!%p28_p7) target bundleno = 13 (0xd), region = 168 }
 0x948   :  { %1557 = vsyncpa [#allocation4], 1 }
 0x949   :  { %1559 = vsyncpa [#allocation4 + $0x1], 1 }

</bundles_post_ra>
